<compile_context>
chip_gen: v7x
topology: tpu7x:2x2x1
jax: 0.10.0
libtpu: 0.0.40
codegen_flags: <defaults>
</compile_context>

<pallas_src>
import functools
import math

import jax
import jax.numpy as jnp
from jax.experimental import pallas as pl
from jax.experimental.pallas import tpu as pltpu

SIGMA = 10.0

# The 24 reference terms come in mirrored pairs with identical values
# ((a-b)^2 == (b-a)^2, |a-b| == |b-a|); each unique offset (dh, dw) --
# "neighbor at (h+dh, w+dw)" -- is therefore counted twice.
_OFFSETS = (
    (1, 0), (0, 1),            # w1/w2,   w3/w4
    (1, 1), (1, -1),           # w5/w6,   w7/w8
    (2, 0), (0, 2),            # w9/w10,  w11/w12
    (2, 1), (2, -1),           # w13/w14, w15/w16
    (1, 2), (1, -2),           # w17/w18, w19/w20
    (2, 2), (2, -2),           # w21/w22, w23/w24
)


def _smooth_loss_kernel(y_ref, o_ref, part_ref, *, H, W, C):
    # y_ref: (8,  L) f32 yCbCr, rows >= 3 are zero padding.
    # o_ref: (C8, L) native dtype, rows >= C are zero padding.
    # L = H*W rounded up to a multiple of 128; flat position p = h*W + w.
    L = y_ref.shape[-1]
    sigma_color = -1.0 / (2.0 * SIGMA * SIGMA)

    y8 = y_ref[...]                                   # (8, L)  f32
    o8 = o_ref[...]                                   # (C8, L) native
    y = y8[:3, :]                                     # offset-0 sublane slice
    o = o8[:C, :].astype(jnp.float32)

    p = jax.lax.broadcasted_iota(jnp.int32, (1, L), 1)   # flat position
    w = p % W                                            # column index

    acc = jnp.zeros((1, L), jnp.float32)
    for dh, dw in _OFFSETS:
        s = dh * W + dw                  # flat offset of the neighbor, >= 1
        shift = (L - s) % L              # rolled[p] == x[p + s]   (mod L)
        y_n = pltpu.roll(y8, shift, 1)[:3, :]
        o_n = pltpu.roll(o8, shift, 1)[:C, :].astype(jnp.float32)

        dy = y_n - y
        ssum = jnp.sum(dy * dy, axis=0, keepdims=True)             # (1, L)
        grad = jnp.sum(jnp.abs(o_n - o), axis=0, keepdims=True)    # L1 over C

        # factor 2 (mirrored pair) and the per-pair spatial-mean denominator
        # are folded into the exp argument; the batch divide stays in the
        # wrapper.
        log_scale = math.log(2.0 / float((H - dh) * (W - abs(dw))))
        wgt = jnp.exp(ssum * sigma_color + log_scale)

        valid = p < (H - dh) * W         # base row still has a neighbor row
        if dw > 0:
            valid = valid & (w < W - dw)
        elif dw < 0:
            valid = valid & (w >= -dw)
        acc = acc + jnp.where(valid, wgt * grad, 0.0)

    # Single cross-lane reduction; lane-dense unmasked full-tile store.
    part_ref[...] = jnp.broadcast_to(jnp.sum(acc), part_ref.shape)


def _rgb2ycbcr(x):
    # Faithful to the PyTorch code: contiguous NCHW memory viewed as (-1, 3)
    # (consecutive flat triples -- NOT per-pixel RGB), 3x3 affine transform,
    # reshaped back to (B, 3, H, W).  Elementwise FMAs instead of a degenerate
    # (N,3)@(3,3) MXU matmul.
    b, _, h, w = x.shape
    f = x.reshape(-1, 3).astype(jnp.float32)
    r, g, bl = f[:, 0], f[:, 1], f[:, 2]
    c0 = 0.257 * r + 0.564 * g + 0.098 * bl + 16.0 / 255.0
    c1 = -0.148 * r - 0.291 * g + 0.439 * bl + 128.0 / 255.0
    c2 = 0.439 * r - 0.368 * g - 0.071 * bl + 128.0 / 255.0
    return jnp.stack([c0, c1, c2], axis=-1).reshape(b, 3, h, w)


@jax.jit
def smooth_loss(inp, out):
    y = _rgb2ycbcr(inp)                        # (B, 3, H, W) f32
    B, _, H, W = y.shape
    C = out.shape[1]
    assert H >= 3 and W >= 3, "offsets reach 2 pixels: need H, W >= 3"

    HW = H * W
    L = ((HW + 127) // 128) * 128              # lane-dense flat spatial axis
    C8 = ((C + 7) // 8) * 8                    # native sublane tiling for roll

    # Flatten spatial dims (free for contiguous NCHW); zero-pad channels to a
    # sublane multiple and the flat axis to a lane multiple.  Zero rows
    # contribute nothing to the channel sums; tail lanes are masked in-kernel.
    y_flat = jnp.pad(y.reshape(B, 3, HW), ((0, 0), (0, 8 - 3), (0, L - HW)))
    o_flat = jnp.pad(out.reshape(B, C, HW), ((0, 0), (0, C8 - C), (0, L - HW)))

    kernel = functools.partial(_smooth_loss_kernel, H=H, W=W, C=C)
    partials = pl.pallas_call(
        kernel,
        out_shape=jax.ShapeDtypeStruct((B, 8, 128), jnp.float32),
        grid=(B,),
        in_specs=[
            pl.BlockSpec((None, 8, L), lambda b: (b, 0, 0)),
            pl.BlockSpec((None, C8, L), lambda b: (b, 0, 0)),
        ],
        out_specs=pl.BlockSpec((None, 8, 128), lambda b: (b, 0, 0)),
        compiler_params=pltpu.CompilerParams(
            dimension_semantics=("parallel",)),
    )(y_flat, o_flat)
    return jnp.sum(partials[:, 0, 0]) / B


# ----------------------------- pure-JAX reference ---------------------------

def _pair_slices(dh, dw):
    """(H, W) slice windows for the neighbor (a) and base (b) operands."""
    hs_a = slice(dh, None) if dh else slice(None)
    hs_b = slice(None, -dh) if dh else slice(None)
    if dw >= 0:
        ws_a = slice(dw, None) if dw else slice(None)
        ws_b = slice(None, -dw) if dw else slice(None)
    else:
        ws_a = slice(None, dw)
        ws_b = slice(-dw, None)
    return (hs_a, ws_a), (hs_b, ws_b)


def _rgb2ycbcr_ref(x):
    mat = jnp.array([[0.257, -0.148, 0.439],
                     [0.564, -0.291, -0.368],
                     [0.098, 0.439, -0.071]], dtype=jnp.float32)
    bias = jnp.array([16.0 / 255.0, 128.0 / 255.0, 128.0 / 255.0],
                     dtype=jnp.float32)
    b, _, h, w = x.shape
    flat = x.reshape(-1, 3).astype(jnp.float32)
    y = jnp.dot(flat, mat, precision=jax.lax.Precision.HIGHEST) + bias
    return y.reshape(b, 3, h, w)


def smooth_loss_ref(inp, out):
    # Mirrors the PyTorch forward: all 24 terms, matmul-based rgb2yCbCr.
    y = _rgb2ycbcr_ref(inp)
    out = out.astype(jnp.float32)
    sc = -1.0 / (2.0 * SIGMA * SIGMA)
    total = jnp.float32(0.0)
    for dh, dw in _OFFSETS:
        a, b = _pair_slices(dh, dw)
        for (ph, pw), (qh, qw) in ((a, b), (b, a)):
            dy = y[:, :, ph, pw] - y[:, :, qh, qw]
            w = jnp.exp(jnp.sum(dy * dy, axis=1, keepdims=True) * sc)
            g = jnp.sum(jnp.abs(out[:, :, ph, pw] - out[:, :, qh, qw]),
                        axis=1, keepdims=True)
            total = total + jnp.mean(w * g)
    return total


if __name__ == "__main__":
    key = jax.random.PRNGKey(0)
    k1, k2 = jax.random.split(key)
    B, C, H, W = 2, 3, 16, 16
    x = jax.random.uniform(k1, (B, C, H, W), dtype=jnp.float32)   # RGB "input"
    o = jax.random.uniform(k2, (B, C, H, W), dtype=jnp.float32)   # "output" image

    loss = smooth_loss(x, o)
    jax.block_until_ready(loss)

    ref = smooth_loss_ref(x, o)
    assert jnp.allclose(loss, ref, rtol=1e-3, atol=1e-5), (float(loss), float(ref))

    print("KERNEL_OK")
</pallas_src>

<mosaic_0001>
module attributes {stable_mosaic.version = 11 : i64} {
  func.func @_smooth_loss_kernel(%arg0: i32, %arg1: memref<1x8x256xf32, #tpu.memory_space<vmem>>, %arg2: memref<1x8x256xf32, #tpu.memory_space<vmem>>, %arg3: memref<1x8x128xf32, #tpu.memory_space<vmem>>) attributes {dimension_semantics = [#tpu.dimension_semantics<parallel>], iteration_bounds = array<i64: 2>, scalar_prefetch = 0 : i64, scratch_operands = 0 : i64, tpu.core_type = #tpu.core_type<tc>, window_params = [{transform_indices = @transform_0, window_bounds = array<i64: 1, 8, 256>}, {transform_indices = @transform_1, window_bounds = array<i64: 1, 8, 256>}, {transform_indices = @transform_2, window_bounds = array<i64: 1, 8, 128>}]} {
    %c0 = arith.constant 0 : index
    %c0_0 = arith.constant 0 : index
    %c0_1 = arith.constant 0 : index
    %0 = vector.load %arg1[%c0, %c0_0, %c0_1] : memref<1x8x256xf32, #tpu.memory_space<vmem>>, vector<1x8x256xf32>
    %1 = vector.shape_cast %0 : vector<1x8x256xf32> to vector<8x256xf32>
    %c0_2 = arith.constant 0 : index
    %c0_3 = arith.constant 0 : index
    %c0_4 = arith.constant 0 : index
    %2 = vector.load %arg2[%c0_2, %c0_3, %c0_4] : memref<1x8x256xf32, #tpu.memory_space<vmem>>, vector<1x8x256xf32>
    %3 = vector.shape_cast %2 : vector<1x8x256xf32> to vector<8x256xf32>
    %4 = vector.extract_strided_slice %1 {offsets = [0, 0], sizes = [3, 256], strides = [1, 1]} : vector<8x256xf32> to vector<3x256xf32>
    %5 = vector.extract_strided_slice %3 {offsets = [0, 0], sizes = [3, 256], strides = [1, 1]} : vector<8x256xf32> to vector<3x256xf32>
    %6 = tpu.iota {dimensions = array<i32: 1>} : vector<1x256xi32>
    %c16_i32 = arith.constant 16 : i32
    %c0_i32 = arith.constant 0 : i32
    %7 = arith.cmpi eq, %c16_i32, %c0_i32 : i32
    %c1_i32 = arith.constant 1 : i32
    %8 = arith.select %7, %c1_i32, %c16_i32 : i32
    %9 = vector.broadcast %8 : i32 to vector<1x256xi32>
    %10 = arith.remsi %6, %9 : vector<1x256xi32>
    %c0_i32_5 = arith.constant 0 : i32
    %11 = vector.broadcast %c0_i32_5 : i32 to vector<1x256xi32>
    %12 = arith.cmpi ne, %10, %11 : vector<1x256xi32>
    %c0_i32_6 = arith.constant 0 : i32
    %13 = vector.broadcast %c0_i32_6 : i32 to vector<1x256xi32>
    %14 = arith.cmpi slt, %10, %13 : vector<1x256xi32>
    %c0_i32_7 = arith.constant 0 : i32
    %15 = arith.cmpi slt, %8, %c0_i32_7 : i32
    %16 = vector.broadcast %15 : i1 to vector<1x256xi1>
    %17 = vector.broadcast %16 : vector<1x256xi1> to vector<1x256xi1>
    %18 = arith.xori %14, %17 : vector<1x256xi1>
    %19 = arith.andi %18, %12 : vector<1x256xi1>
    %20 = vector.broadcast %8 : i32 to vector<1x256xi32>
    %21 = arith.addi %10, %20 : vector<1x256xi32>
    %22 = arith.select %19, %21, %10 : vector<1x256xi1>, vector<1x256xi32>
    %cst = arith.constant 0.000000e+00 : f32
    %23 = vector.broadcast %cst : f32 to vector<1x256xf32>
    %c240_i32 = arith.constant 240 : i32
    %24 = tpu.dynamic_rotate %1 by %c240_i32 dim 1 : vector<8x256xf32>, i32 -> vector<8x256xf32>
    %25 = vector.extract_strided_slice %24 {offsets = [0, 0], sizes = [3, 256], strides = [1, 1]} : vector<8x256xf32> to vector<3x256xf32>
    %c240_i32_8 = arith.constant 240 : i32
    %26 = tpu.dynamic_rotate %3 by %c240_i32_8 dim 1 : vector<8x256xf32>, i32 -> vector<8x256xf32>
    %27 = vector.extract_strided_slice %26 {offsets = [0, 0], sizes = [3, 256], strides = [1, 1]} : vector<8x256xf32> to vector<3x256xf32>
    %28 = arith.subf %25, %4 : vector<3x256xf32>
    %29 = arith.mulf %28, %28 : vector<3x256xf32>
    %cst_9 = arith.constant dense<0.000000e+00> : vector<256xf32>
    %30 = vector.multi_reduction <add>, %29, %cst_9 [0] : vector<3x256xf32> to vector<256xf32>
    %31 = vector.shape_cast %30 : vector<256xf32> to vector<1x256xf32>
    %32 = arith.subf %27, %5 : vector<3x256xf32>
    %33 = math.absf %32 : vector<3x256xf32>
    %cst_10 = arith.constant dense<0.000000e+00> : vector<256xf32>
    %34 = vector.multi_reduction <add>, %33, %cst_10 [0] : vector<3x256xf32> to vector<256xf32>
    %35 = vector.shape_cast %34 : vector<256xf32> to vector<1x256xf32>
    %cst_11 = arith.constant -5.000000e-03 : f32
    %36 = vector.broadcast %cst_11 : f32 to vector<1x256xf32>
    %37 = arith.mulf %31, %36 : vector<1x256xf32>
    %cst_12 = arith.constant -4.7874918 : f32
    %38 = vector.broadcast %cst_12 : f32 to vector<1x256xf32>
    %39 = arith.addf %37, %38 : vector<1x256xf32>
    %40 = math.exp %39 : vector<1x256xf32>
    %c240_i32_13 = arith.constant 240 : i32
    %41 = vector.broadcast %c240_i32_13 : i32 to vector<1x256xi32>
    %42 = arith.cmpi slt, %6, %41 : vector<1x256xi32>
    %43 = arith.mulf %40, %35 : vector<1x256xf32>
    %cst_14 = arith.constant 0.000000e+00 : f32
    %44 = vector.broadcast %cst_14 : f32 to vector<1x256xf32>
    %45 = arith.select %42, %43, %44 : vector<1x256xi1>, vector<1x256xf32>
    %46 = arith.addf %23, %45 : vector<1x256xf32>
    %c255_i32 = arith.constant 255 : i32
    %47 = tpu.dynamic_rotate %1 by %c255_i32 dim 1 : vector<8x256xf32>, i32 -> vector<8x256xf32>
    %48 = vector.extract_strided_slice %47 {offsets = [0, 0], sizes = [3, 256], strides = [1, 1]} : vector<8x256xf32> to vector<3x256xf32>
    %c255_i32_15 = arith.constant 255 : i32
    %49 = tpu.dynamic_rotate %3 by %c255_i32_15 dim 1 : vector<8x256xf32>, i32 -> vector<8x256xf32>
    %50 = vector.extract_strided_slice %49 {offsets = [0, 0], sizes = [3, 256], strides = [1, 1]} : vector<8x256xf32> to vector<3x256xf32>
    %51 = arith.subf %48, %4 : vector<3x256xf32>
    %52 = arith.mulf %51, %51 : vector<3x256xf32>
    %cst_16 = arith.constant dense<0.000000e+00> : vector<256xf32>
    %53 = vector.multi_reduction <add>, %52, %cst_16 [0] : vector<3x256xf32> to vector<256xf32>
    %54 = vector.shape_cast %53 : vector<256xf32> to vector<1x256xf32>
    %55 = arith.subf %50, %5 : vector<3x256xf32>
    %56 = math.absf %55 : vector<3x256xf32>
    %cst_17 = arith.constant dense<0.000000e+00> : vector<256xf32>
    %57 = vector.multi_reduction <add>, %56, %cst_17 [0] : vector<3x256xf32> to vector<256xf32>
    %58 = vector.shape_cast %57 : vector<256xf32> to vector<1x256xf32>
    %cst_18 = arith.constant -5.000000e-03 : f32
    %59 = vector.broadcast %cst_18 : f32 to vector<1x256xf32>
    %60 = arith.mulf %54, %59 : vector<1x256xf32>
    %cst_19 = arith.constant -4.7874918 : f32
    %61 = vector.broadcast %cst_19 : f32 to vector<1x256xf32>
    %62 = arith.addf %60, %61 : vector<1x256xf32>
    %63 = math.exp %62 : vector<1x256xf32>
    %c256_i32 = arith.constant 256 : i32
    %64 = vector.broadcast %c256_i32 : i32 to vector<1x256xi32>
    %65 = arith.cmpi slt, %6, %64 : vector<1x256xi32>
    %c15_i32 = arith.constant 15 : i32
    %66 = vector.broadcast %c15_i32 : i32 to vector<1x256xi32>
    %67 = arith.cmpi slt, %22, %66 : vector<1x256xi32>
    %68 = arith.andi %65, %67 : vector<1x256xi1>
    %69 = arith.mulf %63, %58 : vector<1x256xf32>
    %cst_20 = arith.constant 0.000000e+00 : f32
    %70 = vector.broadcast %cst_20 : f32 to vector<1x256xf32>
    %71 = arith.select %68, %69, %70 : vector<1x256xi1>, vector<1x256xf32>
    %72 = arith.addf %46, %71 : vector<1x256xf32>
    %c239_i32 = arith.constant 239 : i32
    %73 = tpu.dynamic_rotate %1 by %c239_i32 dim 1 : vector<8x256xf32>, i32 -> vector<8x256xf32>
    %74 = vector.extract_strided_slice %73 {offsets = [0, 0], sizes = [3, 256], strides = [1, 1]} : vector<8x256xf32> to vector<3x256xf32>
    %c239_i32_21 = arith.constant 239 : i32
    %75 = tpu.dynamic_rotate %3 by %c239_i32_21 dim 1 : vector<8x256xf32>, i32 -> vector<8x256xf32>
    %76 = vector.extract_strided_slice %75 {offsets = [0, 0], sizes = [3, 256], strides = [1, 1]} : vector<8x256xf32> to vector<3x256xf32>
    %77 = arith.subf %74, %4 : vector<3x256xf32>
    %78 = arith.mulf %77, %77 : vector<3x256xf32>
    %cst_22 = arith.constant dense<0.000000e+00> : vector<256xf32>
    %79 = vector.multi_reduction <add>, %78, %cst_22 [0] : vector<3x256xf32> to vector<256xf32>
    %80 = vector.shape_cast %79 : vector<256xf32> to vector<1x256xf32>
    %81 = arith.subf %76, %5 : vector<3x256xf32>
    %82 = math.absf %81 : vector<3x256xf32>
    %cst_23 = arith.constant dense<0.000000e+00> : vector<256xf32>
    %83 = vector.multi_reduction <add>, %82, %cst_23 [0] : vector<3x256xf32> to vector<256xf32>
    %84 = vector.shape_cast %83 : vector<256xf32> to vector<1x256xf32>
    %cst_24 = arith.constant -5.000000e-03 : f32
    %85 = vector.broadcast %cst_24 : f32 to vector<1x256xf32>
    %86 = arith.mulf %80, %85 : vector<1x256xf32>
    %cst_25 = arith.constant -4.72295332 : f32
    %87 = vector.broadcast %cst_25 : f32 to vector<1x256xf32>
    %88 = arith.addf %86, %87 : vector<1x256xf32>
    %89 = math.exp %88 : vector<1x256xf32>
    %c240_i32_26 = arith.constant 240 : i32
    %90 = vector.broadcast %c240_i32_26 : i32 to vector<1x256xi32>
    %91 = arith.cmpi slt, %6, %90 : vector<1x256xi32>
    %c15_i32_27 = arith.constant 15 : i32
    %92 = vector.broadcast %c15_i32_27 : i32 to vector<1x256xi32>
    %93 = arith.cmpi slt, %22, %92 : vector<1x256xi32>
    %94 = arith.andi %91, %93 : vector<1x256xi1>
    %95 = arith.mulf %89, %84 : vector<1x256xf32>
    %cst_28 = arith.constant 0.000000e+00 : f32
    %96 = vector.broadcast %cst_28 : f32 to vector<1x256xf32>
    %97 = arith.select %94, %95, %96 : vector<1x256xi1>, vector<1x256xf32>
    %98 = arith.addf %72, %97 : vector<1x256xf32>
    %c241_i32 = arith.constant 241 : i32
    %99 = tpu.dynamic_rotate %1 by %c241_i32 dim 1 : vector<8x256xf32>, i32 -> vector<8x256xf32>
    %100 = vector.extract_strided_slice %99 {offsets = [0, 0], sizes = [3, 256], strides = [1, 1]} : vector<8x256xf32> to vector<3x256xf32>
    %c241_i32_29 = arith.constant 241 : i32
    %101 = tpu.dynamic_rotate %3 by %c241_i32_29 dim 1 : vector<8x256xf32>, i32 -> vector<8x256xf32>
    %102 = vector.extract_strided_slice %101 {offsets = [0, 0], sizes = [3, 256], strides = [1, 1]} : vector<8x256xf32> to vector<3x256xf32>
    %103 = arith.subf %100, %4 : vector<3x256xf32>
    %104 = arith.mulf %103, %103 : vector<3x256xf32>
    %cst_30 = arith.constant dense<0.000000e+00> : vector<256xf32>
    %105 = vector.multi_reduction <add>, %104, %cst_30 [0] : vector<3x256xf32> to vector<256xf32>
    %106 = vector.shape_cast %105 : vector<256xf32> to vector<1x256xf32>
    %107 = arith.subf %102, %5 : vector<3x256xf32>
    %108 = math.absf %107 : vector<3x256xf32>
    %cst_31 = arith.constant dense<0.000000e+00> : vector<256xf32>
    %109 = vector.multi_reduction <add>, %108, %cst_31 [0] : vector<3x256xf32> to vector<256xf32>
    %110 = vector.shape_cast %109 : vector<256xf32> to vector<1x256xf32>
    %cst_32 = arith.constant -5.000000e-03 : f32
    %111 = vector.broadcast %cst_32 : f32 to vector<1x256xf32>
    %112 = arith.mulf %106, %111 : vector<1x256xf32>
    %cst_33 = arith.constant -4.72295332 : f32
    %113 = vector.broadcast %cst_33 : f32 to vector<1x256xf32>
    %114 = arith.addf %112, %113 : vector<1x256xf32>
    %115 = math.exp %114 : vector<1x256xf32>
    %c240_i32_34 = arith.constant 240 : i32
    %116 = vector.broadcast %c240_i32_34 : i32 to vector<1x256xi32>
    %117 = arith.cmpi slt, %6, %116 : vector<1x256xi32>
    %c1_i32_35 = arith.constant 1 : i32
    %118 = vector.broadcast %c1_i32_35 : i32 to vector<1x256xi32>
    %119 = arith.cmpi sge, %22, %118 : vector<1x256xi32>
    %120 = arith.andi %117, %119 : vector<1x256xi1>
    %121 = arith.mulf %115, %110 : vector<1x256xf32>
    %cst_36 = arith.constant 0.000000e+00 : f32
    %122 = vector.broadcast %cst_36 : f32 to vector<1x256xf32>
    %123 = arith.select %120, %121, %122 : vector<1x256xi1>, vector<1x256xf32>
    %124 = arith.addf %98, %123 : vector<1x256xf32>
    %c224_i32 = arith.constant 224 : i32
    %125 = tpu.dynamic_rotate %1 by %c224_i32 dim 1 : vector<8x256xf32>, i32 -> vector<8x256xf32>
    %126 = vector.extract_strided_slice %125 {offsets = [0, 0], sizes = [3, 256], strides = [1, 1]} : vector<8x256xf32> to vector<3x256xf32>
    %c224_i32_37 = arith.constant 224 : i32
    %127 = tpu.dynamic_rotate %3 by %c224_i32_37 dim 1 : vector<8x256xf32>, i32 -> vector<8x256xf32>
    %128 = vector.extract_strided_slice %127 {offsets = [0, 0], sizes = [3, 256], strides = [1, 1]} : vector<8x256xf32> to vector<3x256xf32>
    %129 = arith.subf %126, %4 : vector<3x256xf32>
    %130 = arith.mulf %129, %129 : vector<3x256xf32>
    %cst_38 = arith.constant dense<0.000000e+00> : vector<256xf32>
    %131 = vector.multi_reduction <add>, %130, %cst_38 [0] : vector<3x256xf32> to vector<256xf32>
    %132 = vector.shape_cast %131 : vector<256xf32> to vector<1x256xf32>
    %133 = arith.subf %128, %5 : vector<3x256xf32>
    %134 = math.absf %133 : vector<3x256xf32>
    %cst_39 = arith.constant dense<0.000000e+00> : vector<256xf32>
    %135 = vector.multi_reduction <add>, %134, %cst_39 [0] : vector<3x256xf32> to vector<256xf32>
    %136 = vector.shape_cast %135 : vector<256xf32> to vector<1x256xf32>
    %cst_40 = arith.constant -5.000000e-03 : f32
    %137 = vector.broadcast %cst_40 : f32 to vector<1x256xf32>
    %138 = arith.mulf %132, %137 : vector<1x256xf32>
    %cst_41 = arith.constant -4.71849871 : f32
    %139 = vector.broadcast %cst_41 : f32 to vector<1x256xf32>
    %140 = arith.addf %138, %139 : vector<1x256xf32>
    %141 = math.exp %140 : vector<1x256xf32>
    %c224_i32_42 = arith.constant 224 : i32
    %142 = vector.broadcast %c224_i32_42 : i32 to vector<1x256xi32>
    %143 = arith.cmpi slt, %6, %142 : vector<1x256xi32>
    %144 = arith.mulf %141, %136 : vector<1x256xf32>
    %cst_43 = arith.constant 0.000000e+00 : f32
    %145 = vector.broadcast %cst_43 : f32 to vector<1x256xf32>
    %146 = arith.select %143, %144, %145 : vector<1x256xi1>, vector<1x256xf32>
    %147 = arith.addf %124, %146 : vector<1x256xf32>
    %c254_i32 = arith.constant 254 : i32
    %148 = tpu.dynamic_rotate %1 by %c254_i32 dim 1 : vector<8x256xf32>, i32 -> vector<8x256xf32>
    %149 = vector.extract_strided_slice %148 {offsets = [0, 0], sizes = [3, 256], strides = [1, 1]} : vector<8x256xf32> to vector<3x256xf32>
    %c254_i32_44 = arith.constant 254 : i32
    %150 = tpu.dynamic_rotate %3 by %c254_i32_44 dim 1 : vector<8x256xf32>, i32 -> vector<8x256xf32>
    %151 = vector.extract_strided_slice %150 {offsets = [0, 0], sizes = [3, 256], strides = [1, 1]} : vector<8x256xf32> to vector<3x256xf32>
    %152 = arith.subf %149, %4 : vector<3x256xf32>
    %153 = arith.mulf %152, %152 : vector<3x256xf32>
    %cst_45 = arith.constant dense<0.000000e+00> : vector<256xf32>
    %154 = vector.multi_reduction <add>, %153, %cst_45 [0] : vector<3x256xf32> to vector<256xf32>
    %155 = vector.shape_cast %154 : vector<256xf32> to vector<1x256xf32>
    %156 = arith.subf %151, %5 : vector<3x256xf32>
    %157 = math.absf %156 : vector<3x256xf32>
    %cst_46 = arith.constant dense<0.000000e+00> : vector<256xf32>
    %158 = vector.multi_reduction <add>, %157, %cst_46 [0] : vector<3x256xf32> to vector<256xf32>
    %159 = vector.shape_cast %158 : vector<256xf32> to vector<1x256xf32>
    %cst_47 = arith.constant -5.000000e-03 : f32
    %160 = vector.broadcast %cst_47 : f32 to vector<1x256xf32>
    %161 = arith.mulf %155, %160 : vector<1x256xf32>
    %cst_48 = arith.constant -4.71849871 : f32
    %162 = vector.broadcast %cst_48 : f32 to vector<1x256xf32>
    %163 = arith.addf %161, %162 : vector<1x256xf32>
    %164 = math.exp %163 : vector<1x256xf32>
    %c256_i32_49 = arith.constant 256 : i32
    %165 = vector.broadcast %c256_i32_49 : i32 to vector<1x256xi32>
    %166 = arith.cmpi slt, %6, %165 : vector<1x256xi32>
    %c14_i32 = arith.constant 14 : i32
    %167 = vector.broadcast %c14_i32 : i32 to vector<1x256xi32>
    %168 = arith.cmpi slt, %22, %167 : vector<1x256xi32>
    %169 = arith.andi %166, %168 : vector<1x256xi1>
    %170 = arith.mulf %164, %159 : vector<1x256xf32>
    %cst_50 = arith.constant 0.000000e+00 : f32
    %171 = vector.broadcast %cst_50 : f32 to vector<1x256xf32>
    %172 = arith.select %169, %170, %171 : vector<1x256xi1>, vector<1x256xf32>
    %173 = arith.addf %147, %172 : vector<1x256xf32>
    %c223_i32 = arith.constant 223 : i32
    %174 = tpu.dynamic_rotate %1 by %c223_i32 dim 1 : vector<8x256xf32>, i32 -> vector<8x256xf32>
    %175 = vector.extract_strided_slice %174 {offsets = [0, 0], sizes = [3, 256], strides = [1, 1]} : vector<8x256xf32> to vector<3x256xf32>
    %c223_i32_51 = arith.constant 223 : i32
    %176 = tpu.dynamic_rotate %3 by %c223_i32_51 dim 1 : vector<8x256xf32>, i32 -> vector<8x256xf32>
    %177 = vector.extract_strided_slice %176 {offsets = [0, 0], sizes = [3, 256], strides = [1, 1]} : vector<8x256xf32> to vector<3x256xf32>
    %178 = arith.subf %175, %4 : vector<3x256xf32>
    %179 = arith.mulf %178, %178 : vector<3x256xf32>
    %cst_52 = arith.constant dense<0.000000e+00> : vector<256xf32>
    %180 = vector.multi_reduction <add>, %179, %cst_52 [0] : vector<3x256xf32> to vector<256xf32>
    %181 = vector.shape_cast %180 : vector<256xf32> to vector<1x256xf32>
    %182 = arith.subf %177, %5 : vector<3x256xf32>
    %183 = math.absf %182 : vector<3x256xf32>
    %cst_53 = arith.constant dense<0.000000e+00> : vector<256xf32>
    %184 = vector.multi_reduction <add>, %183, %cst_53 [0] : vector<3x256xf32> to vector<256xf32>
    %185 = vector.shape_cast %184 : vector<256xf32> to vector<1x256xf32>
    %cst_54 = arith.constant -5.000000e-03 : f32
    %186 = vector.broadcast %cst_54 : f32 to vector<1x256xf32>
    %187 = arith.mulf %181, %186 : vector<1x256xf32>
    %cst_55 = arith.constant -4.653960e+00 : f32
    %188 = vector.broadcast %cst_55 : f32 to vector<1x256xf32>
    %189 = arith.addf %187, %188 : vector<1x256xf32>
    %190 = math.exp %189 : vector<1x256xf32>
    %c224_i32_56 = arith.constant 224 : i32
    %191 = vector.broadcast %c224_i32_56 : i32 to vector<1x256xi32>
    %192 = arith.cmpi slt, %6, %191 : vector<1x256xi32>
    %c15_i32_57 = arith.constant 15 : i32
    %193 = vector.broadcast %c15_i32_57 : i32 to vector<1x256xi32>
    %194 = arith.cmpi slt, %22, %193 : vector<1x256xi32>
    %195 = arith.andi %192, %194 : vector<1x256xi1>
    %196 = arith.mulf %190, %185 : vector<1x256xf32>
    %cst_58 = arith.constant 0.000000e+00 : f32
    %197 = vector.broadcast %cst_58 : f32 to vector<1x256xf32>
    %198 = arith.select %195, %196, %197 : vector<1x256xi1>, vector<1x256xf32>
    %199 = arith.addf %173, %198 : vector<1x256xf32>
    %c225_i32 = arith.constant 225 : i32
    %200 = tpu.dynamic_rotate %1 by %c225_i32 dim 1 : vector<8x256xf32>, i32 -> vector<8x256xf32>
    %201 = vector.extract_strided_slice %200 {offsets = [0, 0], sizes = [3, 256], strides = [1, 1]} : vector<8x256xf32> to vector<3x256xf32>
    %c225_i32_59 = arith.constant 225 : i32
    %202 = tpu.dynamic_rotate %3 by %c225_i32_59 dim 1 : vector<8x256xf32>, i32 -> vector<8x256xf32>
    %203 = vector.extract_strided_slice %202 {offsets = [0, 0], sizes = [3, 256], strides = [1, 1]} : vector<8x256xf32> to vector<3x256xf32>
    %204 = arith.subf %201, %4 : vector<3x256xf32>
    %205 = arith.mulf %204, %204 : vector<3x256xf32>
    %cst_60 = arith.constant dense<0.000000e+00> : vector<256xf32>
    %206 = vector.multi_reduction <add>, %205, %cst_60 [0] : vector<3x256xf32> to vector<256xf32>
    %207 = vector.shape_cast %206 : vector<256xf32> to vector<1x256xf32>
    %208 = arith.subf %203, %5 : vector<3x256xf32>
    %209 = math.absf %208 : vector<3x256xf32>
    %cst_61 = arith.constant dense<0.000000e+00> : vector<256xf32>
    %210 = vector.multi_reduction <add>, %209, %cst_61 [0] : vector<3x256xf32> to vector<256xf32>
    %211 = vector.shape_cast %210 : vector<256xf32> to vector<1x256xf32>
    %cst_62 = arith.constant -5.000000e-03 : f32
    %212 = vector.broadcast %cst_62 : f32 to vector<1x256xf32>
    %213 = arith.mulf %207, %212 : vector<1x256xf32>
    %cst_63 = arith.constant -4.653960e+00 : f32
    %214 = vector.broadcast %cst_63 : f32 to vector<1x256xf32>
    %215 = arith.addf %213, %214 : vector<1x256xf32>
    %216 = math.exp %215 : vector<1x256xf32>
    %c224_i32_64 = arith.constant 224 : i32
    %217 = vector.broadcast %c224_i32_64 : i32 to vector<1x256xi32>
    %218 = arith.cmpi slt, %6, %217 : vector<1x256xi32>
    %c1_i32_65 = arith.constant 1 : i32
    %219 = vector.broadcast %c1_i32_65 : i32 to vector<1x256xi32>
    %220 = arith.cmpi sge, %22, %219 : vector<1x256xi32>
    %221 = arith.andi %218, %220 : vector<1x256xi1>
    %222 = arith.mulf %216, %211 : vector<1x256xf32>
    %cst_66 = arith.constant 0.000000e+00 : f32
    %223 = vector.broadcast %cst_66 : f32 to vector<1x256xf32>
    %224 = arith.select %221, %222, %223 : vector<1x256xi1>, vector<1x256xf32>
    %225 = arith.addf %199, %224 : vector<1x256xf32>
    %c238_i32 = arith.constant 238 : i32
    %226 = tpu.dynamic_rotate %1 by %c238_i32 dim 1 : vector<8x256xf32>, i32 -> vector<8x256xf32>
    %227 = vector.extract_strided_slice %226 {offsets = [0, 0], sizes = [3, 256], strides = [1, 1]} : vector<8x256xf32> to vector<3x256xf32>
    %c238_i32_67 = arith.constant 238 : i32
    %228 = tpu.dynamic_rotate %3 by %c238_i32_67 dim 1 : vector<8x256xf32>, i32 -> vector<8x256xf32>
    %229 = vector.extract_strided_slice %228 {offsets = [0, 0], sizes = [3, 256], strides = [1, 1]} : vector<8x256xf32> to vector<3x256xf32>
    %230 = arith.subf %227, %4 : vector<3x256xf32>
    %231 = arith.mulf %230, %230 : vector<3x256xf32>
    %cst_68 = arith.constant dense<0.000000e+00> : vector<256xf32>
    %232 = vector.multi_reduction <add>, %231, %cst_68 [0] : vector<3x256xf32> to vector<256xf32>
    %233 = vector.shape_cast %232 : vector<256xf32> to vector<1x256xf32>
    %234 = arith.subf %229, %5 : vector<3x256xf32>
    %235 = math.absf %234 : vector<3x256xf32>
    %cst_69 = arith.constant dense<0.000000e+00> : vector<256xf32>
    %236 = vector.multi_reduction <add>, %235, %cst_69 [0] : vector<3x256xf32> to vector<256xf32>
    %237 = vector.shape_cast %236 : vector<256xf32> to vector<1x256xf32>
    %cst_70 = arith.constant -5.000000e-03 : f32
    %238 = vector.broadcast %cst_70 : f32 to vector<1x256xf32>
    %239 = arith.mulf %233, %238 : vector<1x256xf32>
    %cst_71 = arith.constant -4.653960e+00 : f32
    %240 = vector.broadcast %cst_71 : f32 to vector<1x256xf32>
    %241 = arith.addf %239, %240 : vector<1x256xf32>
    %242 = math.exp %241 : vector<1x256xf32>
    %c240_i32_72 = arith.constant 240 : i32
    %243 = vector.broadcast %c240_i32_72 : i32 to vector<1x256xi32>
    %244 = arith.cmpi slt, %6, %243 : vector<1x256xi32>
    %c14_i32_73 = arith.constant 14 : i32
    %245 = vector.broadcast %c14_i32_73 : i32 to vector<1x256xi32>
    %246 = arith.cmpi slt, %22, %245 : vector<1x256xi32>
    %247 = arith.andi %244, %246 : vector<1x256xi1>
    %248 = arith.mulf %242, %237 : vector<1x256xf32>
    %cst_74 = arith.constant 0.000000e+00 : f32
    %249 = vector.broadcast %cst_74 : f32 to vector<1x256xf32>
    %250 = arith.select %247, %248, %249 : vector<1x256xi1>, vector<1x256xf32>
    %251 = arith.addf %225, %250 : vector<1x256xf32>
    %c242_i32 = arith.constant 242 : i32
    %252 = tpu.dynamic_rotate %1 by %c242_i32 dim 1 : vector<8x256xf32>, i32 -> vector<8x256xf32>
    %253 = vector.extract_strided_slice %252 {offsets = [0, 0], sizes = [3, 256], strides = [1, 1]} : vector<8x256xf32> to vector<3x256xf32>
    %c242_i32_75 = arith.constant 242 : i32
    %254 = tpu.dynamic_rotate %3 by %c242_i32_75 dim 1 : vector<8x256xf32>, i32 -> vector<8x256xf32>
    %255 = vector.extract_strided_slice %254 {offsets = [0, 0], sizes = [3, 256], strides = [1, 1]} : vector<8x256xf32> to vector<3x256xf32>
    %256 = arith.subf %253, %4 : vector<3x256xf32>
    %257 = arith.mulf %256, %256 : vector<3x256xf32>
    %cst_76 = arith.constant dense<0.000000e+00> : vector<256xf32>
    %258 = vector.multi_reduction <add>, %257, %cst_76 [0] : vector<3x256xf32> to vector<256xf32>
    %259 = vector.shape_cast %258 : vector<256xf32> to vector<1x256xf32>
    %260 = arith.subf %255, %5 : vector<3x256xf32>
    %261 = math.absf %260 : vector<3x256xf32>
    %cst_77 = arith.constant dense<0.000000e+00> : vector<256xf32>
    %262 = vector.multi_reduction <add>, %261, %cst_77 [0] : vector<3x256xf32> to vector<256xf32>
    %263 = vector.shape_cast %262 : vector<256xf32> to vector<1x256xf32>
    %cst_78 = arith.constant -5.000000e-03 : f32
    %264 = vector.broadcast %cst_78 : f32 to vector<1x256xf32>
    %265 = arith.mulf %259, %264 : vector<1x256xf32>
    %cst_79 = arith.constant -4.653960e+00 : f32
    %266 = vector.broadcast %cst_79 : f32 to vector<1x256xf32>
    %267 = arith.addf %265, %266 : vector<1x256xf32>
    %268 = math.exp %267 : vector<1x256xf32>
    %c240_i32_80 = arith.constant 240 : i32
    %269 = vector.broadcast %c240_i32_80 : i32 to vector<1x256xi32>
    %270 = arith.cmpi slt, %6, %269 : vector<1x256xi32>
    %c2_i32 = arith.constant 2 : i32
    %271 = vector.broadcast %c2_i32 : i32 to vector<1x256xi32>
    %272 = arith.cmpi sge, %22, %271 : vector<1x256xi32>
    %273 = arith.andi %270, %272 : vector<1x256xi1>
    %274 = arith.mulf %268, %263 : vector<1x256xf32>
    %cst_81 = arith.constant 0.000000e+00 : f32
    %275 = vector.broadcast %cst_81 : f32 to vector<1x256xf32>
    %276 = arith.select %273, %274, %275 : vector<1x256xi1>, vector<1x256xf32>
    %277 = arith.addf %251, %276 : vector<1x256xf32>
    %c222_i32 = arith.constant 222 : i32
    %278 = tpu.dynamic_rotate %1 by %c222_i32 dim 1 : vector<8x256xf32>, i32 -> vector<8x256xf32>
    %279 = vector.extract_strided_slice %278 {offsets = [0, 0], sizes = [3, 256], strides = [1, 1]} : vector<8x256xf32> to vector<3x256xf32>
    %c222_i32_82 = arith.constant 222 : i32
    %280 = tpu.dynamic_rotate %3 by %c222_i32_82 dim 1 : vector<8x256xf32>, i32 -> vector<8x256xf32>
    %281 = vector.extract_strided_slice %280 {offsets = [0, 0], sizes = [3, 256], strides = [1, 1]} : vector<8x256xf32> to vector<3x256xf32>
    %282 = arith.subf %279, %4 : vector<3x256xf32>
    %283 = arith.mulf %282, %282 : vector<3x256xf32>
    %cst_83 = arith.constant dense<0.000000e+00> : vector<256xf32>
    %284 = vector.multi_reduction <add>, %283, %cst_83 [0] : vector<3x256xf32> to vector<256xf32>
    %285 = vector.shape_cast %284 : vector<256xf32> to vector<1x256xf32>
    %286 = arith.subf %281, %5 : vector<3x256xf32>
    %287 = math.absf %286 : vector<3x256xf32>
    %cst_84 = arith.constant dense<0.000000e+00> : vector<256xf32>
    %288 = vector.multi_reduction <add>, %287, %cst_84 [0] : vector<3x256xf32> to vector<256xf32>
    %289 = vector.shape_cast %288 : vector<256xf32> to vector<1x256xf32>
    %cst_85 = arith.constant -5.000000e-03 : f32
    %290 = vector.broadcast %cst_85 : f32 to vector<1x256xf32>
    %291 = arith.mulf %285, %290 : vector<1x256xf32>
    %cst_86 = arith.constant -4.58496761 : f32
    %292 = vector.broadcast %cst_86 : f32 to vector<1x256xf32>
    %293 = arith.addf %291, %292 : vector<1x256xf32>
    %294 = math.exp %293 : vector<1x256xf32>
    %c224_i32_87 = arith.constant 224 : i32
    %295 = vector.broadcast %c224_i32_87 : i32 to vector<1x256xi32>
    %296 = arith.cmpi slt, %6, %295 : vector<1x256xi32>
    %c14_i32_88 = arith.constant 14 : i32
    %297 = vector.broadcast %c14_i32_88 : i32 to vector<1x256xi32>
    %298 = arith.cmpi slt, %22, %297 : vector<1x256xi32>
    %299 = arith.andi %296, %298 : vector<1x256xi1>
    %300 = arith.mulf %294, %289 : vector<1x256xf32>
    %cst_89 = arith.constant 0.000000e+00 : f32
    %301 = vector.broadcast %cst_89 : f32 to vector<1x256xf32>
    %302 = arith.select %299, %300, %301 : vector<1x256xi1>, vector<1x256xf32>
    %303 = arith.addf %277, %302 : vector<1x256xf32>
    %c226_i32 = arith.constant 226 : i32
    %304 = tpu.dynamic_rotate %1 by %c226_i32 dim 1 : vector<8x256xf32>, i32 -> vector<8x256xf32>
    %305 = vector.extract_strided_slice %304 {offsets = [0, 0], sizes = [3, 256], strides = [1, 1]} : vector<8x256xf32> to vector<3x256xf32>
    %c226_i32_90 = arith.constant 226 : i32
    %306 = tpu.dynamic_rotate %3 by %c226_i32_90 dim 1 : vector<8x256xf32>, i32 -> vector<8x256xf32>
    %307 = vector.extract_strided_slice %306 {offsets = [0, 0], sizes = [3, 256], strides = [1, 1]} : vector<8x256xf32> to vector<3x256xf32>
    %308 = arith.subf %305, %4 : vector<3x256xf32>
    %309 = arith.mulf %308, %308 : vector<3x256xf32>
    %cst_91 = arith.constant dense<0.000000e+00> : vector<256xf32>
    %310 = vector.multi_reduction <add>, %309, %cst_91 [0] : vector<3x256xf32> to vector<256xf32>
    %311 = vector.shape_cast %310 : vector<256xf32> to vector<1x256xf32>
    %312 = arith.subf %307, %5 : vector<3x256xf32>
    %313 = math.absf %312 : vector<3x256xf32>
    %cst_92 = arith.constant dense<0.000000e+00> : vector<256xf32>
    %314 = vector.multi_reduction <add>, %313, %cst_92 [0] : vector<3x256xf32> to vector<256xf32>
    %315 = vector.shape_cast %314 : vector<256xf32> to vector<1x256xf32>
    %cst_93 = arith.constant -5.000000e-03 : f32
    %316 = vector.broadcast %cst_93 : f32 to vector<1x256xf32>
    %317 = arith.mulf %311, %316 : vector<1x256xf32>
    %cst_94 = arith.constant -4.58496761 : f32
    %318 = vector.broadcast %cst_94 : f32 to vector<1x256xf32>
    %319 = arith.addf %317, %318 : vector<1x256xf32>
    %320 = math.exp %319 : vector<1x256xf32>
    %c224_i32_95 = arith.constant 224 : i32
    %321 = vector.broadcast %c224_i32_95 : i32 to vector<1x256xi32>
    %322 = arith.cmpi slt, %6, %321 : vector<1x256xi32>
    %c2_i32_96 = arith.constant 2 : i32
    %323 = vector.broadcast %c2_i32_96 : i32 to vector<1x256xi32>
    %324 = arith.cmpi sge, %22, %323 : vector<1x256xi32>
    %325 = arith.andi %322, %324 : vector<1x256xi1>
    %326 = arith.mulf %320, %315 : vector<1x256xf32>
    %cst_97 = arith.constant 0.000000e+00 : f32
    %327 = vector.broadcast %cst_97 : f32 to vector<1x256xf32>
    %328 = arith.select %325, %326, %327 : vector<1x256xi1>, vector<1x256xf32>
    %329 = arith.addf %303, %328 : vector<1x256xf32>
    %330 = vector.shape_cast %329 : vector<1x256xf32> to vector<1x1x256xf32>
    %cst_98 = arith.constant dense<0.000000e+00> : vector<1xf32>
    %331 = vector.multi_reduction <add>, %330, %cst_98 [1, 2] : vector<1x1x256xf32> to vector<1xf32>
    %332 = vector.shape_cast %331 : vector<1xf32> to vector<1x1x1xf32>
    %333 = vector.extract %332[0, 0, 0] : f32 from vector<1x1x1xf32>
    %334 = vector.broadcast %333 : f32 to vector<8x128xf32>
    %c0_99 = arith.constant 0 : index
    %c0_100 = arith.constant 0 : index
    %c0_101 = arith.constant 0 : index
    %335 = vector.load %arg3[%c0_99, %c0_100, %c0_101] : memref<1x8x128xf32, #tpu.memory_space<vmem>>, vector<1x8x128xf32>
    %336 = vector.shape_cast %335 : vector<1x8x128xf32> to vector<8x128xf32>
    %337 = vector.shape_cast %334 : vector<8x128xf32> to vector<1x8x128xf32>
    tpu.vector_store %arg3[%c0_99, %c0_100, %c0_101], %337 {strides = array<i32>} : memref<1x8x128xf32, #tpu.memory_space<vmem>>, vector<1x8x128xf32>,
    return
  }
  func.func @transform_0(%arg0: i32) -> (i32, i32, i32) {
    %c0_i32 = arith.constant 0 : i32
    %c0_i32_0 = arith.constant 0 : i32
    %c0_i32_1 = arith.constant 0 : i32
    return %arg0, %c0_i32, %c0_i32_0 : i32, i32, i32
  }
  func.func @transform_1(%arg0: i32) -> (i32, i32, i32) {
    %c0_i32 = arith.constant 0 : i32
    %c0_i32_0 = arith.constant 0 : i32
    %c0_i32_1 = arith.constant 0 : i32
    return %arg0, %c0_i32, %c0_i32_0 : i32, i32, i32
  }
  func.func @transform_2(%arg0: i32) -> (i32, i32, i32) {
    %c0_i32 = arith.constant 0 : i32
    %c0_i32_0 = arith.constant 0 : i32
    %c0_i32_1 = arith.constant 0 : i32
    return %arg0, %c0_i32, %c0_i32_0 : i32, i32, i32
  }
}

</mosaic_0001>

<bundles_post_ra>
// kernel: smooth_loss.1
= control target key start
LH: loop header
LB: loop body
LE: loop exit
PB: predicated region body
PF: predicated region fallthrough
CT: control target
= control target key end

     0   :  { %s1185_s9 = smov 0   ;;  %s1741_s0 = inlined_call_operand.vmem [shape: f32[2,8,256], index: 0, kind: input, shape index: {}]   ;;  %s1742_s1 = inlined_call_operand.vmem [shape: f32[2,8,256], index: 1, kind: input, shape index: {}]   ;;  %s1743_s2 = inlined_call_operand.vmem [shape: f32[2,8,128], index: 2, kind: output, shape index: {}]  }
   0x1 LB: > { %s1064_s10 = sadd.s32 4294967295, %s1156_s9   ;;  %p1068_p0 = scmp.ge.s32.totalorder %s1156_s9, 1  ;;  %s1156_s9 = sphi %s1185_s9, %s12_s9  }
   0x2   : > { %p122_p1 = scmp.lt.s32.totalorder %s1156_s9, 3 }
   0x4   : > { %p123_p2 = pnand %p1068_p0, %p122_p1 }
   0x5   : > { %p148_p3 = scmp.lt.s32.totalorder (!%p123_p2), %s1064_s10, 1  ;;  %s1158_s15 = smov (!%p123_p2), 127   ;;  %v166_v4 = vlaneseq (!%p123_p2)  ;;  %vm210_vm3 = vcmask (!%p123_p2), 1042432  }
   0x6   : > { %126 = sbr.rel (%p123_p2) target bundleno = 513 (0x201), region = 28  ;;  %s1159_s16 = smov (!%p123_p2), 112  }
   0x7   : > { %s1160_s17 = smov (!%p123_p2), 111   ;;  %s1161_s18 = smov (!%p123_p2), 113   ;;  %v1302_v5 = vand.u32 (!%p123_p2), 127, %v166_v4 }
   0x8   : > { %s1162_s19 = smov (!%p123_p2), 96   ;;  %s1163_s20 = smov (!%p123_p2), 126  }
   0x9   : > { %s1164_s21 = smov (!%p123_p2), 95   ;;  %s1165_s22 = smov (!%p123_p2), 97   ;;  %vm263_vm0 = vcmp.lt.s32.totalorder (!%p123_p2), %v1302_v5, 127  ;;  %vm197_vm1 = vcmp.lt.s32.totalorder (!%p123_p2), %v1302_v5, 112  ;;  %vm332_vm2 = vcmp.lt.s32.totalorder (!%p123_p2), %v1302_v5, 111  ;;  %vm397_vm4 = vcmp.lt.s32.totalorder (!%p123_p2), %v1302_v5, 113 }
   0xa   : > { %s1166_s23 = smov (!%p123_p2), 110   ;;  %s1167_s27 = smov (!%p123_p2), 114   ;;  %v1325_v26 = vadd.s32 (!%p123_p2), 128, %v1302_v5  ;;  %vm464_vm5 = vcmp.lt.s32.totalorder (!%p123_p2), %v1302_v5, 96  ;;  %v1335_v39 = vand.u32 (!%p123_p2), 15, %v1302_v5  ;;  %vm529_vm6 = vcmp.lt.s32.totalorder (!%p123_p2), %v1302_v5, 126 }
   0xb   : > { %s1168_s28 = smov (!%p123_p2), 94   ;;  %s1169_s29 = smov (!%p123_p2), 98   ;;  %vm596_vm7 = vcmp.lt.s32.totalorder (!%p123_p2), %v1302_v5, 95  ;;  %vm661_vm8 = vcmp.lt.s32.totalorder (!%p123_p2), %v1302_v5, 97  ;;  %vm726_vm9 = vcmp.lt.s32.totalorder (!%p123_p2), %v1302_v5, 110  ;;  %vm791_vm10 = vcmp.lt.s32.totalorder (!%p123_p2), %v1302_v5, 114 }
   0xc   : > { %v1338_v40 = vand.u32 (!%p123_p2), 15, %v1325_v26  ;;  %vm858_vm11 = vcmp.lt.s32.totalorder (!%p123_p2), %v1302_v5, 94  ;;  %vm252_vm12 = vcmp.lt.s32.totalorder (!%p123_p2), %v1325_v26, 240  ;;  %vm923_vm13 = vcmp.lt.s32.totalorder (!%p123_p2), %v1302_v5, 98 }
   0xd   : > { %s1757_s10 = smov (!%p148_p3, %s1064_s10), 1  ;;  %vm318_vm14 = vcmp.lt.s32.totalorder %v1335_v39, 15 }
   0xe   : > { %s1076_s11 = sshll.u32 %s1757_s10, 4  ;;  %vm319_vm15 = vcmp.lt.s32.totalorder %v1338_v40, 15  ;;  %s1073_s30 = sshll.u32 %s1757_s10, 3 }
   0xf   : > { %s152_s14 = scalar_lea.vmem %s1741_s0, %s1076_s11  ;;  %s1246_s26 = scalar_lea.vmem %s1742_s1, %s1076_s11 }
  0x10   : > { %v1201_v0 = vld [vmem:[%s152_s14] sm:$0xff]  ;;  %v1207_v1 = vld [vmem:[%s152_s14 + $0x8] sm:$0xff]  ;;  %s161_s5 = scalar_lea.vmem %s1743_s2, %s1073_s30 }
  0x11   : > { %259 = vrot.lane.b32.xlu1 %v1201_v0, %s1158_s15  ;;  %193 = vrot.lane.b32.xlu0 %v1201_v0, %s1159_s16  ;;  %v1251_v2 = vld [vmem:[%s1246_s26 + $0x8] sm:$0xff]  ;;  %v1254_v3 = vld [vmem:[%s1246_s26] sm:$0xff] }
  0x15   : > { %261 = vrot.lane.b32.xlu1 %v1207_v1, %s1158_s15  ;;  %195 = vrot.lane.b32.xlu0 %v1207_v1, %s1159_s16 }
  0x19   : > { %330 = vrot.lane.b32.xlu1 %v1207_v1, %s1160_s17  ;;  %328 = vrot.lane.b32.xlu0 %v1201_v0, %s1160_s17 }
  0x1d   : > { %395 = vrot.lane.b32.xlu1 %v1207_v1, %s1161_s18  ;;  %393 = vrot.lane.b32.xlu0 %v1201_v0, %s1161_s18 }
  0x21   : > { %462 = vrot.lane.b32.xlu1 %v1207_v1, %s1162_s19  ;;  %460 = vrot.lane.b32.xlu0 %v1201_v0, %s1162_s19 }
  0x25   : > { %527 = vrot.lane.b32.xlu1 %v1207_v1, %s1163_s20  ;;  %525 = vrot.lane.b32.xlu0 %v1201_v0, %s1163_s20 }
  0x29   : > { %594 = vrot.lane.b32.xlu1 %v1207_v1, %s1164_s21  ;;  %592 = vrot.lane.b32.xlu0 %v1201_v0, %s1164_s21 }
  0x2d   : > { %659 = vrot.lane.b32.xlu1 %v1207_v1, %s1165_s22  ;;  %657 = vrot.lane.b32.xlu0 %v1201_v0, %s1165_s22 }
  0x31   : > { %724 = vrot.lane.b32.xlu1 %v1207_v1, %s1166_s23  ;;  %722 = vrot.lane.b32.xlu0 %v1201_v0, %s1166_s23 }
  0x35   : > { %789 = vrot.lane.b32.xlu1 %v1207_v1, %s1167_s27  ;;  %787 = vrot.lane.b32.xlu0 %v1201_v0, %s1167_s27 }
  0x39   : > { %202 = vrot.lane.b32.xlu1 %v1251_v2, %s1159_s16  ;;  %200 = vrot.lane.b32.xlu0 %v1254_v3, %s1159_s16 }
  0x3d   : > { %268 = vrot.lane.b32.xlu1 %v1251_v2, %s1158_s15  ;;  %266 = vrot.lane.b32.xlu0 %v1254_v3, %s1158_s15 }
  0x41   : > { %856 = vrot.lane.b32.xlu1 %v1207_v1, %s1168_s28  ;;  %854 = vrot.lane.b32.xlu0 %v1201_v0, %s1168_s28 }
  0x45   : > { %337 = vrot.lane.b32.xlu1 %v1251_v2, %s1160_s17  ;;  %335 = vrot.lane.b32.xlu0 %v1254_v3, %s1160_s17 }
  0x49   : > { %921 = vrot.lane.b32.xlu1 %v1207_v1, %s1169_s29  ;;  %919 = vrot.lane.b32.xlu0 %v1201_v0, %s1169_s29 }
  0x4d   : > { %402 = vrot.lane.b32.xlu1 %v1251_v2, %s1161_s18  ;;  %400 = vrot.lane.b32.xlu0 %v1254_v3, %s1161_s18 }
  0x51   : > { %469 = vrot.lane.b32.xlu1 %v1251_v2, %s1162_s19  ;;  %467 = vrot.lane.b32.xlu0 %v1254_v3, %s1162_s19 }
  0x55   : > { %534 = vrot.lane.b32.xlu1 %v1251_v2, %s1163_s20  ;;  %532 = vrot.lane.b32.xlu0 %v1254_v3, %s1163_s20 }
  0x59   : > { %601 = vrot.lane.b32.xlu1 %v1251_v2, %s1164_s21  ;;  %599 = vrot.lane.b32.xlu0 %v1254_v3, %s1164_s21 }
  0x5d   : > { %666 = vrot.lane.b32.xlu1 %v1251_v2, %s1165_s22  ;;  %664 = vrot.lane.b32.xlu0 %v1254_v3, %s1165_s22 }
  0x61   : > { %731 = vrot.lane.b32.xlu1 %v1251_v2, %s1166_s23  ;;  %729 = vrot.lane.b32.xlu0 %v1254_v3, %s1166_s23 }
  0x65   : > { %796 = vrot.lane.b32.xlu1 %v1251_v2, %s1167_s27  ;;  %794 = vrot.lane.b32.xlu0 %v1254_v3, %s1167_s27 }
  0x69   : > { %863 = vrot.lane.b32.xlu1 %v1251_v2, %s1168_s28  ;;  %861 = vrot.lane.b32.xlu0 %v1254_v3, %s1168_s28 }
  0x6d   : > { %928 = vrot.lane.b32.xlu1 %v1251_v2, %s1169_s29  ;;  %926 = vrot.lane.b32.xlu0 %v1254_v3, %s1169_s29 }
  0x83   : > { %v260_v6 = vpop.permute.xlu1 %259  ;;  %v194_v7 = vpop.permute.xlu0 %193 }
  0x87   : > { %v262_v8 = vpop.permute.xlu1 %261  ;;  %v196_v9 = vpop.permute.xlu0 %195 }
  0x88   : > { %v264_v10 = vsel %vm263_vm0, %v260_v6, %v262_v8  ;;  %v265_v11 = vsel %vm263_vm0, %v262_v8, %v260_v6  ;;  %v198_v12 = vsel %vm197_vm1, %v194_v7, %v196_v9  ;;  %v199_v13 = vsel %vm197_vm1, %v196_v9, %v194_v7 }
  0x89   : > { %v272_v14 = vsub.f32 %v264_v10, %v1201_v0  ;;  %v273_v15 = vsub.f32 %v265_v11, %v1207_v1  ;;  %v206_v16 = vsub.f32 %v198_v12, %v1201_v0  ;;  %v207_v17 = vsub.f32 %v199_v13, %v1207_v1 }
  0x8b   : > { %v274_v18 = vmul.f32 %v272_v14, %v272_v14  ;;  %v275_v19 = vmul.f32 %v273_v15, %v273_v15  ;;  %v208_v20 = vmul.f32 %v206_v16, %v206_v16  ;;  %v209_v21 = vmul.f32 %v207_v17, %v207_v17  ;;  %v331_v22 = vpop.permute.xlu1 %330  ;;  %v329_v23 = vpop.permute.xlu0 %328 }
  0x8c   : > { %v333_v24 = vsel %vm332_vm2, %v329_v23, %v331_v22  ;;  %v334_v25 = vsel %vm332_vm2, %v331_v22, %v329_v23 }
  0x8d   : > { %v276_v27 = vsel %vm210_vm3, %v274_v18, 0.0  ;;  %v283_v28 = vsel %vm210_vm3, %v275_v19, 0.0  ;;  %v211_v29 = vsel %vm210_vm3, %v208_v20, 0.0  ;;  %v218_v30 = vsel %vm210_vm3, %v209_v21, 0.0 }
  0x8e   : > { %v277_v31 = vrot.slane %v276_v27, 4  ;;  %v284_v32 = vrot.slane %v283_v28, 4  ;;  %v212_v33 = vrot.slane %v211_v29, 4  ;;  %v219_v34 = vrot.slane %v218_v30, 4 }
  0x8f   : > { %v341_v35 = vsub.f32 %v333_v24, %v1201_v0  ;;  %v342_v36 = vsub.f32 %v334_v25, %v1207_v1  ;;  %v396_v37 = vpop.permute.xlu1 %395  ;;  %v394_v38 = vpop.permute.xlu0 %393 }
  0x90   : > { %v278_v41 = vadd.f32 %v277_v31, %v276_v27  ;;  %v285_v42 = vadd.f32 %v284_v32, %v283_v28  ;;  %v213_v43 = vadd.f32 %v212_v33, %v211_v29  ;;  %v220_v44 = vadd.f32 %v219_v34, %v218_v30 }
  0x91   : > { %v343_v45 = vmul.f32 %v341_v35, %v341_v35  ;;  %v344_v46 = vmul.f32 %v342_v36, %v342_v36  ;;  %v398_v47 = vsel %vm397_vm4, %v394_v38, %v396_v37  ;;  %v399_v48 = vsel %vm397_vm4, %v396_v37, %v394_v38 }
  0x92   : > { %v279_v49 = vrot.slane %v278_v41, 2  ;;  %v286_v50 = vrot.slane %v285_v42, 2  ;;  %v214_v51 = vrot.slane %v213_v43, 2  ;;  %v221_v52 = vrot.slane %v220_v44, 2 }
  0x93   : > { %v345_v53 = vsel %vm210_vm3, %v343_v45, 0.0  ;;  %v352_v54 = vsel %vm210_vm3, %v344_v46, 0.0  ;;  %v406_v55 = vsub.f32 %v398_v47, %v1201_v0  ;;  %v407_v56 = vsub.f32 %v399_v48, %v1207_v1  ;;  %v463_v14 = vpop.permute.xlu1 %462  ;;  %v461_v15 = vpop.permute.xlu0 %460 }
  0x94   : > { %v280_v57 = vadd.f32 %v279_v49, %v278_v41  ;;  %v287_v58 = vadd.f32 %v286_v50, %v285_v42  ;;  %v215_v59 = vadd.f32 %v214_v51, %v213_v43  ;;  %v222_v60 = vadd.f32 %v221_v52, %v220_v44 }
  0x95   : > { %v346_v61 = vrot.slane %v345_v53, 4  ;;  %v353_v62 = vrot.slane %v352_v54, 4  ;;  %v408_v63 = vmul.f32 %v406_v55, %v406_v55  ;;  %v409_v4 = vmul.f32 %v407_v56, %v407_v56 }
  0x96   : > { %v281_v6 = vrot.slane %v280_v57, 1  ;;  %v288_v7 = vrot.slane %v287_v58, 1  ;;  %v216_v8 = vrot.slane %v215_v59, 1  ;;  %v223_v9 = vrot.slane %v222_v60, 1 }
  0x97   : > { %v347_v10 = vadd.f32 %v346_v61, %v345_v53  ;;  %v354_v11 = vadd.f32 %v353_v62, %v352_v54  ;;  %v410_v12 = vsel %vm210_vm3, %v408_v63, 0.0  ;;  %v417_v13 = vsel %vm210_vm3, %v409_v4, 0.0  ;;  %v528_v47 = vpop.permute.xlu1 %527  ;;  %v526_v48 = vpop.permute.xlu0 %525 }
  0x98   : > { %v282_v16 = vadd.f32 %v281_v6, %v280_v57  ;;  %v289_v17 = vadd.f32 %v288_v7, %v287_v58  ;;  %v217_v18 = vadd.f32 %v216_v8, %v215_v59  ;;  %v224_v19 = vadd.f32 %v223_v9, %v222_v60 }
  0x99   : > { %v348_v20 = vrot.slane %v347_v10, 2  ;;  %v355_v21 = vrot.slane %v354_v11, 2  ;;  %v411_v22 = vrot.slane %v410_v12, 4  ;;  %v418_v23 = vrot.slane %v417_v13, 4 }
  0x9a   : > { %v308_v24 = vmul.f32 -0.005, %v282_v16  ;;  %v309_v25 = vmul.f32 -0.005, %v289_v17  ;;  %v243_v27 = vmul.f32 -0.005, %v217_v18  ;;  %v465_v28 = vsel %vm464_vm5, %v461_v15, %v463_v14 }
  0x9b   : > { %v244_v29 = vmul.f32 -0.005, %v224_v19  ;;  %v349_v30 = vadd.f32 %v348_v20, %v347_v10  ;;  %v356_v31 = vadd.f32 %v355_v21, %v354_v11  ;;  %v412_v32 = vadd.f32 %v411_v22, %v410_v12  ;;  %v595_v10 = vpop.permute.xlu1 %594  ;;  %v593_v11 = vpop.permute.xlu0 %592 }
  0x9c   : > { %v310_v33 = vadd.f32 -4.787492, %v308_v24  ;;  %v311_v34 = vadd.f32 -4.787492, %v309_v25  ;;  %v245_v35 = vadd.f32 -4.787492, %v243_v27  ;;  %v419_v36 = vadd.f32 %v418_v23, %v417_v13 }
  0x9d   : > { %v246_v37 = vadd.f32 -4.787492, %v244_v29  ;;  %v350_v38 = vrot.slane %v349_v30, 1  ;;  %v357_v41 = vrot.slane %v356_v31, 1  ;;  %v413_v42 = vrot.slane %v412_v32, 2 }
  0x9e   : > { %v312_v43 = vmul.f32 1.442695, %v310_v33  ;;  %v314_v44 = vmul.f32 1.442695, %v311_v34  ;;  %v247_v45 = vmul.f32 1.442695, %v245_v35  ;;  %v466_v46 = vsel %vm464_vm5, %v463_v14, %v461_v15 }
  0x9f   : > { %v249_v49 = vmul.f32 1.442695, %v246_v37  ;;  %v351_v50 = vadd.f32 %v350_v38, %v349_v30  ;;  %v358_v51 = vadd.f32 %v357_v41, %v356_v31  ;;  %v414_v52 = vadd.f32 %v413_v42, %v412_v32  ;;  %v658_v37 = vpop.permute.xlu0 %657 }
  0xa0   : > { %1100 = vpow2.f32 %v312_v43  ;;  %v420_v53 = vrot.slane %v419_v36, 2  ;;  %v473_v54 = vsub.f32 %v465_v28, %v1201_v0  ;;  %v474_v55 = vsub.f32 %v466_v46, %v1207_v1 }
  0xa1   : > { %1102 = vpow2.f32 %v314_v44  ;;  %v377_v56 = vmul.f32 -0.005, %v351_v50  ;;  %v378_v57 = vmul.f32 -0.005, %v358_v51  ;;  %v415_v58 = vrot.slane %v414_v52, 1 }
  0xa2   : > { %1104 = vpow2.f32 %v247_v45  ;;  %v421_v59 = vadd.f32 %v420_v53, %v419_v36  ;;  %v475_v60 = vmul.f32 %v473_v54, %v473_v54  ;;  %v476_v61 = vmul.f32 %v474_v55, %v474_v55  ;;  %v660_v36 = vpop.permute.xlu1 %659 }
  0xa3   : > { %1106 = vpow2.f32 %v249_v49  ;;  %v379_v62 = vadd.f32 -4.7229533, %v377_v56  ;;  %v380_v63 = vadd.f32 -4.7229533, %v378_v57  ;;  %v416_v4 = vadd.f32 %v415_v58, %v414_v52 }
  0xa4   : > { %v422_v6 = vrot.slane %v421_v59, 1  ;;  %v477_v7 = vsel %vm210_vm3, %v475_v60, 0.0  ;;  %v484_v8 = vsel %vm210_vm3, %v476_v61, 0.0  ;;  %v530_v9 = vsel %vm529_vm6, %v526_v48, %v528_v47 }
  0xa5   : > { %v381_v12 = vmul.f32 1.442695, %v379_v62  ;;  %v383_v13 = vmul.f32 1.442695, %v380_v63  ;;  %v442_v14 = vmul.f32 -0.005, %v416_v4  ;;  %v531_v15 = vsel %vm529_vm6, %v528_v47, %v526_v48 }
  0xa6   : > { %v423_v16 = vadd.f32 %v422_v6, %v421_v59  ;;  %v478_v17 = vrot.slane %v477_v7, 4  ;;  %v485_v18 = vrot.slane %v484_v8, 4  ;;  %v538_v19 = vsub.f32 %v530_v9, %v1201_v0 }
  0xa7   : > { %1108 = vpow2.f32 %v381_v12  ;;  %v444_v20 = vadd.f32 -4.7229533, %v442_v14  ;;  %v539_v21 = vsub.f32 %v531_v15, %v1207_v1  ;;  %v597_v22 = vsel %vm596_vm7, %v593_v11, %v595_v10 }
  0xa8   : > { %1110 = vpow2.f32 %v383_v13  ;;  %v443_v23 = vmul.f32 -0.005, %v423_v16  ;;  %v479_v24 = vadd.f32 %v478_v17, %v477_v7  ;;  %v486_v25 = vadd.f32 %v485_v18, %v484_v8 }
  0xa9   : > { %v446_v27 = vmul.f32 1.442695, %v444_v20  ;;  %v540_v28 = vmul.f32 %v538_v19, %v538_v19  ;;  %v541_v29 = vmul.f32 %v539_v21, %v539_v21  ;;  %v598_v30 = vsel %vm596_vm7, %v595_v10, %v593_v11 }
  0xaa   : > { %v1371_v31 = vpop.eup %1100  ;;  %v445_v32 = vadd.f32 -4.7229533, %v443_v23  ;;  %v480_v33 = vrot.slane %v479_v24, 2  ;;  %v487_v34 = vrot.slane %v486_v25, 2  ;;  %v605_v35 = vsub.f32 %v597_v22, %v1201_v0 }
  0xab   : > { %v1374_v38 = vpop.eup %1102  ;;  %1112 = vpow2.f32 %v446_v27  ;;  %v542_v41 = vsel %vm210_vm3, %v540_v28, 0.0  ;;  %v549_v42 = vsel %vm210_vm3, %v541_v29, 0.0  ;;  %v606_v43 = vsub.f32 %v598_v30, %v1207_v1  ;;  %v725_v30 = vpop.permute.xlu1 %724 }
  0xac   : > { %v1379_v44 = vpop.eup %1104  ;;  %v448_v45 = vmul.f32 1.442695, %v445_v32  ;;  %v481_v46 = vadd.f32 %v480_v33, %v479_v24  ;;  %v488_v47 = vadd.f32 %v487_v34, %v486_v25  ;;  %v543_v48 = vrot.slane %v542_v41, 4  ;;  %v723_v32 = vpop.permute.xlu0 %722 }
  0xad   : > { %v1381_v49 = vpop.eup %1106  ;;  %v550_v50 = vrot.slane %v549_v42, 4  ;;  %v607_v51 = vmul.f32 %v605_v35, %v605_v35  ;;  %v608_v52 = vmul.f32 %v606_v43, %v606_v43  ;;  %v662_v53 = vsel %vm661_vm8, %v658_v37, %v660_v36 }
  0xae   : > { %1114 = vpow2.f32 %v448_v45  ;;  %v482_v54 = vrot.slane %v481_v46, 1  ;;  %v489_v55 = vrot.slane %v488_v47, 1  ;;  %v544_v56 = vadd.f32 %v543_v48, %v542_v41 }
  0xaf   : > { %v551_v57 = vadd.f32 %v550_v50, %v549_v42  ;;  %v609_v58 = vsel %vm210_vm3, %v607_v51, 0.0  ;;  %v616_v59 = vsel %vm210_vm3, %v608_v52, 0.0  ;;  %v663_v60 = vsel %vm661_vm8, %v660_v36, %v658_v37 }
  0xb0   : > { %v483_v61 = vadd.f32 %v482_v54, %v481_v46  ;;  %v490_v62 = vadd.f32 %v489_v55, %v488_v47  ;;  %v545_v63 = vrot.slane %v544_v56, 2  ;;  %v610_v4 = vrot.slane %v609_v58, 4 }
  0xb1   : > { %v1390_v6 = vpop.eup %1108  ;;  %v552_v7 = vrot.slane %v551_v57, 2  ;;  %v617_v8 = vrot.slane %v616_v59, 4  ;;  %v670_v9 = vsub.f32 %v662_v53, %v1201_v0  ;;  %v671_v10 = vsub.f32 %v663_v60, %v1207_v1 }
  0xb2   : > { %v1394_v11 = vpop.eup %1110  ;;  %v509_v12 = vmul.f32 -0.005, %v483_v61  ;;  %v510_v13 = vmul.f32 -0.005, %v490_v62  ;;  %v546_v14 = vadd.f32 %v545_v63, %v544_v56  ;;  %v611_v15 = vadd.f32 %v610_v4, %v609_v58  ;;  %v790_v61 = vpop.permute.xlu1 %789 }
  0xb3   : > { %v553_v16 = vadd.f32 %v552_v7, %v551_v57  ;;  %v618_v17 = vadd.f32 %v617_v8, %v616_v59  ;;  %v672_v18 = vmul.f32 %v670_v9, %v670_v9  ;;  %v673_v19 = vmul.f32 %v671_v10, %v671_v10  ;;  %v788_v62 = vpop.permute.xlu0 %787 }
  0xb4   : > { %v511_v20 = vadd.f32 -4.7184987, %v509_v12  ;;  %v512_v21 = vadd.f32 -4.7184987, %v510_v13  ;;  %v547_v22 = vrot.slane %v546_v14, 1  ;;  %v612_v23 = vrot.slane %v611_v15, 2 }
  0xb5   : > { %v1396_v24 = vpop.eup %1112  ;;  %v554_v25 = vrot.slane %v553_v16, 1  ;;  %v619_v27 = vrot.slane %v618_v17, 2  ;;  %v674_v28 = vsel %vm210_vm3, %v672_v18, 0.0  ;;  %v681_v29 = vsel %vm210_vm3, %v673_v19, 0.0 }
  0xb6   : > { %v513_v33 = vmul.f32 1.442695, %v511_v20  ;;  %v515_v34 = vmul.f32 1.442695, %v512_v21  ;;  %v548_v35 = vadd.f32 %v547_v22, %v546_v14  ;;  %v613_v36 = vadd.f32 %v612_v23, %v611_v15 }
  0xb7   : > { %v555_v37 = vadd.f32 %v554_v25, %v553_v16  ;;  %v620_v41 = vadd.f32 %v619_v27, %v618_v17  ;;  %v675_v42 = vrot.slane %v674_v28, 4  ;;  %v682_v43 = vrot.slane %v681_v29, 4 }
  0xb8   : > { %v1401_v45 = vpop.eup %1114  ;;  %1116 = vpow2.f32 %v513_v33  ;;  %v574_v46 = vmul.f32 -0.005, %v548_v35  ;;  %v614_v47 = vrot.slane %v613_v36, 1  ;;  %v727_v48 = vsel %vm726_vm9, %v723_v32, %v725_v30 }
  0xb9   : > { %1118 = vpow2.f32 %v515_v34  ;;  %v575_v50 = vmul.f32 -0.005, %v555_v37  ;;  %v621_v51 = vrot.slane %v620_v41, 1  ;;  %v676_v52 = vadd.f32 %v675_v42, %v674_v28 }
  0xba   : > { %v576_v53 = vadd.f32 -4.7184987, %v574_v46  ;;  %v615_v54 = vadd.f32 %v614_v47, %v613_v36  ;;  %v683_v55 = vadd.f32 %v682_v43, %v681_v29  ;;  %v728_v56 = vsel %vm726_vm9, %v725_v30, %v723_v32  ;;  %v203_v30 = vpop.permute.xlu1 %202  ;;  %v201_v32 = vpop.permute.xlu0 %200 }
  0xbb   : > { %v577_v57 = vadd.f32 -4.7184987, %v575_v50  ;;  %v622_v58 = vadd.f32 %v621_v51, %v620_v41  ;;  %v677_v59 = vrot.slane %v676_v52, 2  ;;  %v735_v60 = vsub.f32 %v727_v48, %v1201_v0 }
  0xbc   : > { %v578_v63 = vmul.f32 1.442695, %v576_v53  ;;  %v641_v4 = vmul.f32 -0.005, %v615_v54  ;;  %v684_v7 = vrot.slane %v683_v55, 2  ;;  %v736_v8 = vsub.f32 %v728_v56, %v1207_v1 }
  0xbd   : > { %v580_v9 = vmul.f32 1.442695, %v577_v57  ;;  %v642_v10 = vmul.f32 -0.005, %v622_v58  ;;  %v678_v12 = vadd.f32 %v677_v59, %v676_v52  ;;  %v737_v13 = vmul.f32 %v735_v60, %v735_v60 }
  0xbe   : > { %1120 = vpow2.f32 %v578_v63  ;;  %v643_v14 = vadd.f32 -4.65396, %v641_v4  ;;  %v685_v15 = vadd.f32 %v684_v7, %v683_v55  ;;  %v738_v16 = vmul.f32 %v736_v8, %v736_v8 }
  0xbf   : > { %1122 = vpow2.f32 %v580_v9  ;;  %v644_v17 = vadd.f32 -4.65396, %v642_v10  ;;  %v679_v18 = vrot.slane %v678_v12, 1  ;;  %v739_v19 = vsel %vm210_vm3, %v737_v13, 0.0  ;;  %v269_v10 = vpop.permute.xlu1 %268 }
  0xc0   : > { %v645_v20 = vmul.f32 1.442695, %v643_v14  ;;  %v686_v21 = vrot.slane %v685_v15, 1  ;;  %v740_v22 = vrot.slane %v739_v19, 4  ;;  %v746_v23 = vsel %vm210_vm3, %v738_v16, 0.0 }
  0xc1   : > { %v647_v25 = vmul.f32 1.442695, %v644_v17  ;;  %v680_v27 = vadd.f32 %v679_v18, %v678_v12  ;;  %v747_v28 = vrot.slane %v746_v23, 4  ;;  %v792_v29 = vsel %vm791_vm10, %v788_v62, %v790_v61  ;;  %v267_v12 = vpop.permute.xlu0 %266 }
  0xc2   : > { %v1413_v33 = vpop.eup %1116  ;;  %1124 = vpow2.f32 %v645_v20  ;;  %v687_v34 = vadd.f32 %v686_v21, %v685_v15  ;;  %v741_v35 = vadd.f32 %v740_v22, %v739_v19  ;;  %v793_v36 = vsel %vm791_vm10, %v790_v61, %v788_v62 }
  0xc3   : > { %v1417_v37 = vpop.eup %1118  ;;  %1126 = vpow2.f32 %v647_v25  ;;  %v706_v41 = vmul.f32 -0.005, %v680_v27  ;;  %v748_v42 = vadd.f32 %v747_v28, %v746_v23  ;;  %v800_v43 = vsub.f32 %v792_v29, %v1201_v0 }
  0xc4   : > { %v707_v46 = vmul.f32 -0.005, %v687_v34  ;;  %v742_v47 = vrot.slane %v741_v35, 2  ;;  %v801_v48 = vsub.f32 %v793_v36, %v1207_v1  ;;  %v204_v50 = vsel %vm197_vm1, %v201_v32, %v203_v30 }
  0xc5   : > { %v708_v51 = vadd.f32 -4.65396, %v706_v41  ;;  %v749_v52 = vrot.slane %v748_v42, 2  ;;  %v802_v53 = vmul.f32 %v800_v43, %v800_v43  ;;  %v205_v54 = vsel %vm197_vm1, %v203_v30, %v201_v32 }
  0xc6   : > { %v709_v55 = vadd.f32 -4.65396, %v707_v46  ;;  %v743_v56 = vadd.f32 %v742_v47, %v741_v35  ;;  %v803_v57 = vmul.f32 %v801_v48, %v801_v48  ;;  %v225_v58 = vsub.f32 %v204_v50, %v1254_v3 }
  0xc7   : > { %v710_v59 = vmul.f32 1.442695, %v708_v51  ;;  %v750_v60 = vadd.f32 %v749_v52, %v748_v42  ;;  %v804_v61 = vsel %vm210_vm3, %v802_v53, 0.0  ;;  %v226_v62 = vsub.f32 %v205_v54, %v1251_v2  ;;  %v857_v53 = vpop.permute.xlu1 %856  ;;  %v855_v54 = vpop.permute.xlu0 %854 }
  0xc8   : > { %v1428_v63 = vpop.eup %1120  ;;  %v712_v4 = vmul.f32 1.442695, %v709_v55  ;;  %v744_v7 = vrot.slane %v743_v56, 1  ;;  %v805_v8 = vrot.slane %v804_v61, 4  ;;  %v811_v9 = vsel %vm210_vm3, %v803_v57, 0.0 }
  0xc9   : > { %v1431_v13 = vpop.eup %1122  ;;  %1128 = vpow2.f32 %v710_v59  ;;  %v751_v14 = vrot.slane %v750_v60, 1  ;;  %v812_v15 = vrot.slane %v811_v9, 4  ;;  %v227_v16 = vand.u32 2147483647, %v225_v58 }
  0xca   : > { %1130 = vpow2.f32 %v712_v4  ;;  %v745_v17 = vadd.f32 %v744_v7, %v743_v56  ;;  %v806_v18 = vadd.f32 %v805_v8, %v804_v61  ;;  %v228_v19 = vand.u32 2147483647, %v226_v62 }
  0xcb   : > { %v752_v20 = vadd.f32 %v751_v14, %v750_v60  ;;  %v813_v21 = vadd.f32 %v812_v15, %v811_v9  ;;  %v229_v22 = vsel %vm210_vm3, %v227_v16, 0.0  ;;  %v270_v23 = vsel %vm263_vm0, %v267_v12, %v269_v10 }
  0xcc   : > { %v1437_v25 = vpop.eup %1124  ;;  %v771_v27 = vmul.f32 -0.005, %v745_v17  ;;  %v807_v28 = vrot.slane %v806_v18, 2  ;;  %v230_v29 = vrot.slane %v229_v22, 4  ;;  %v236_v30 = vsel %vm210_vm3, %v228_v19, 0.0 }
  0xcd   : > { %v1440_v32 = vpop.eup %1126  ;;  %v772_v34 = vmul.f32 -0.005, %v752_v20  ;;  %v814_v35 = vrot.slane %v813_v21, 2  ;;  %v237_v36 = vrot.slane %v236_v30, 4  ;;  %v271_v41 = vsel %vm263_vm0, %v269_v10, %v267_v12  ;;  %vm1515_vm0 = vmand %vm252_vm12, %vm319_vm15 }
  0xce   : > { %v773_v42 = vadd.f32 -4.65396, %v771_v27  ;;  %v808_v43 = vadd.f32 %v807_v28, %v806_v18  ;;  %v231_v46 = vadd.f32 %v230_v29, %v229_v22  ;;  %v290_v47 = vsub.f32 %v270_v23, %v1254_v3  ;;  %v338_v27 = vpop.permute.xlu1 %337  ;;  %v336_v28 = vpop.permute.xlu0 %335 }
  0xcf   : > { %v774_v48 = vadd.f32 -4.65396, %v772_v34  ;;  %v815_v50 = vadd.f32 %v814_v35, %v813_v21  ;;  %v238_v51 = vadd.f32 %v237_v36, %v236_v30  ;;  %v291_v52 = vsub.f32 %v271_v41, %v1251_v2 }
  0xd0   : > { %v775_v55 = vmul.f32 1.442695, %v773_v42  ;;  %v809_v56 = vrot.slane %v808_v43, 1  ;;  %v232_v57 = vrot.slane %v231_v46, 2  ;;  %v292_v58 = vand.u32 2147483647, %v290_v47 }
  0xd1   : > { %v777_v59 = vmul.f32 1.442695, %v774_v48  ;;  %v816_v60 = vrot.slane %v815_v50, 1  ;;  %v239_v61 = vrot.slane %v238_v51, 2  ;;  %v293_v62 = vand.u32 2147483647, %v291_v52 }
  0xd2   : > { %1132 = vpow2.f32 %v775_v55  ;;  %v810_v4 = vadd.f32 %v809_v56, %v808_v43  ;;  %v233_v7 = vadd.f32 %v232_v57, %v231_v46  ;;  %v294_v8 = vsel %vm210_vm3, %v292_v58, 0.0 }
  0xd3   : > { %v1448_v9 = vpop.eup %1128  ;;  %1134 = vpow2.f32 %v777_v59  ;;  %v817_v10 = vadd.f32 %v816_v60, %v815_v50  ;;  %v240_v12 = vadd.f32 %v239_v61, %v238_v51  ;;  %v295_v14 = vrot.slane %v294_v8, 4  ;;  %v922_v60 = vpop.permute.xlu1 %921 }
  0xd4   : > { %v1451_v15 = vpop.eup %1130  ;;  %v836_v16 = vmul.f32 -0.005, %v810_v4  ;;  %v234_v17 = vrot.slane %v233_v7, 1  ;;  %v301_v18 = vsel %vm210_vm3, %v293_v62, 0.0  ;;  %v859_v19 = vsel %vm858_vm11, %v855_v54, %v857_v53  ;;  %v920_v61 = vpop.permute.xlu0 %919 }
  0xd5   : > { %v837_v20 = vmul.f32 -0.005, %v817_v10  ;;  %v241_v21 = vrot.slane %v240_v12, 1  ;;  %v296_v22 = vadd.f32 %v295_v14, %v294_v8  ;;  %v302_v23 = vrot.slane %v301_v18, 4 }
  0xd6   : > { %v838_v29 = vadd.f32 -4.65396, %v836_v16  ;;  %v235_v30 = vadd.f32 %v234_v17, %v233_v7  ;;  %v860_v34 = vsel %vm858_vm11, %v857_v53, %v855_v54  ;;  %v867_v35 = vsub.f32 %v859_v19, %v1201_v0 }
  0xd7   : > { %v839_v36 = vadd.f32 -4.65396, %v837_v20  ;;  %v242_v41 = vadd.f32 %v241_v21, %v240_v12  ;;  %v297_v42 = vrot.slane %v296_v22, 2  ;;  %v303_v43 = vadd.f32 %v302_v23, %v301_v18 }
  0xd8   : > { %v840_v46 = vmul.f32 1.442695, %v838_v29  ;;  %v253_v47 = vmul.f32 %v1379_v44, %v235_v30  ;;  %v868_v48 = vsub.f32 %v860_v34, %v1207_v1  ;;  %v869_v50 = vmul.f32 %v867_v35, %v867_v35 }
  0xd9   : > { %v842_v51 = vmul.f32 1.442695, %v839_v36  ;;  %v254_v52 = vmul.f32 %v1381_v49, %v242_v41  ;;  %v298_v55 = vadd.f32 %v297_v42, %v296_v22  ;;  %v304_v56 = vrot.slane %v303_v43, 2 }
  0xda   : > { %1136 = vpow2.f32 %v840_v46  ;;  %v870_v53 = vmul.f32 %v868_v48, %v868_v48  ;;  %v871_v54 = vsel %vm210_vm3, %v869_v50, 0.0  ;;  %v339_v57 = vsel %vm332_vm2, %v336_v28, %v338_v27 }
  0xdb   : > { %1138 = vpow2.f32 %v842_v51  ;;  %v256_v44 = vsel %vm252_vm12, %v254_v52, 0.0  ;;  %v299_v58 = vrot.slane %v298_v55, 1  ;;  %v305_v59 = vadd.f32 %v304_v56, %v303_v43  ;;  %v401_v56 = vpop.permute.xlu0 %400 }
  0xdc   : > { %v1469_v62 = vpop.eup %1132  ;;  %v872_v49 = vrot.slane %v871_v54, 4  ;;  %v878_v4 = vsel %vm210_vm3, %v870_v53, 0.0  ;;  %v340_v7 = vsel %vm332_vm2, %v338_v27, %v336_v28  ;;  %v359_v8 = vsub.f32 %v339_v57, %v1254_v3 }
  0xdd   : > { %v1475_v10 = vpop.eup %1134  ;;  %v300_v12 = vadd.f32 %v299_v58, %v298_v55  ;;  %v306_v14 = vrot.slane %v305_v59, 1  ;;  %v879_v16 = vrot.slane %v878_v4, 4  ;;  %v360_v17 = vsub.f32 %v340_v7, %v1251_v2 }
  0xde   : > { %v873_v18 = vadd.f32 %v872_v49, %v871_v54  ;;  %v361_v19 = vand.u32 2147483647, %v359_v8  ;;  %v924_v20 = vsel %vm923_vm13, %v920_v61, %v922_v60  ;;  %v925_v21 = vsel %vm923_vm13, %v922_v60, %v920_v61 }
  0xdf   : > { %v307_v22 = vadd.f32 %v306_v14, %v305_v59  ;;  %v322_v23 = vmul.f32 %v1371_v31, %v300_v12  ;;  %v880_v27 = vadd.f32 %v879_v16, %v878_v4  ;;  %v362_v28 = vand.u32 2147483647, %v360_v17 }
  0xe0   : > { %v874_v29 = vrot.slane %v873_v18, 2  ;;  %v363_v30 = vsel %vm210_vm3, %v361_v19, 0.0  ;;  %v932_v34 = vsub.f32 %v924_v20, %v1201_v0  ;;  %v933_v35 = vsub.f32 %v925_v21, %v1207_v1  ;;  %v403_v1 = vpop.permute.xlu1 %402 }
  0xe1   : > { %v323_v36 = vmul.f32 %v1374_v38, %v307_v22  ;;  %v324_v41 = vsel %vm318_vm14, %v322_v23, 0.0  ;;  %v881_v42 = vrot.slane %v880_v27, 2  ;;  %v364_v43 = vrot.slane %v363_v30, 4 }
  0xe2   : > { %v1489_v46 = vadd.f32 %v324_v41, %v253_v47  ;;  %v875_v48 = vadd.f32 %v874_v29, %v873_v18  ;;  %v370_v31 = vsel %vm210_vm3, %v362_v28, 0.0  ;;  %v934_v50 = vmul.f32 %v932_v34, %v932_v34 }
  0xe3   : > { %v325_v51 = vsel %vm319_vm15, %v323_v36, 0.0  ;;  %v882_v52 = vadd.f32 %v881_v42, %v880_v27  ;;  %v365_v0 = vadd.f32 %v364_v43, %v363_v30  ;;  %v371_v55 = vrot.slane %v370_v31, 4  ;;  %v468_v30 = vpop.permute.xlu0 %467 }
  0xe4   : > { %v1494_v38 = vpop.eup %1136  ;;  %v1496_v53 = vadd.f32 %v325_v51, %v256_v44  ;;  %v876_v54 = vrot.slane %v875_v48, 1  ;;  %v935_v57 = vmul.f32 %v933_v35, %v933_v35  ;;  %v936_v47 = vsel %vm210_vm3, %v934_v50, 0.0  ;;  %v470_v29 = vpop.permute.xlu1 %469 }
  0xe5   : > { %v1499_v58 = vpop.eup %1138  ;;  %v883_v59 = vrot.slane %v882_v52, 1  ;;  %v366_v60 = vrot.slane %v365_v0, 2  ;;  %v372_v61 = vadd.f32 %v371_v55, %v370_v31  ;;  %v937_v49 = vrot.slane %v936_v47, 4 }
  0xe6   : > { %v877_v4 = vadd.f32 %v876_v54, %v875_v48  ;;  %v943_v7 = vsel %vm210_vm3, %v935_v57, 0.0  ;;  %v404_v8 = vsel %vm397_vm4, %v401_v56, %v403_v1  ;;  %v405_v44 = vsel %vm397_vm4, %v403_v1, %v401_v56 }
  0xe7   : > { %v884_v12 = vadd.f32 %v883_v59, %v882_v52  ;;  %v367_v14 = vadd.f32 %v366_v60, %v365_v0  ;;  %v373_v16 = vrot.slane %v372_v61, 2  ;;  %v938_v17 = vadd.f32 %v937_v49, %v936_v47  ;;  %v533_v49 = vpop.permute.xlu0 %532 }
  0xe8   : > { %v903_v18 = vmul.f32 -0.005, %v877_v4  ;;  %v944_v19 = vrot.slane %v943_v7, 4  ;;  %v424_v20 = vsub.f32 %v404_v8, %v1254_v3  ;;  %v425_v21 = vsub.f32 %v405_v44, %v1251_v2 }
  0xe9   : > { %v904_v22 = vmul.f32 -0.005, %v884_v12  ;;  %v368_v23 = vrot.slane %v367_v14, 1  ;;  %v374_v27 = vadd.f32 %v373_v16, %v372_v61  ;;  %v939_v28 = vrot.slane %v938_v17, 2  ;;  %v535_v61 = vpop.permute.xlu1 %534 }
  0xea   : > { %v905_v34 = vadd.f32 -4.5849676, %v903_v18  ;;  %v945_v35 = vadd.f32 %v944_v19, %v943_v7  ;;  %v426_v36 = vand.u32 2147483647, %v424_v20  ;;  %v427_v41 = vand.u32 2147483647, %v425_v21 }
  0xeb   : > { %v906_v42 = vadd.f32 -4.5849676, %v904_v22  ;;  %v369_v43 = vadd.f32 %v368_v23, %v367_v14  ;;  %v375_v48 = vrot.slane %v374_v27, 1  ;;  %v940_v31 = vadd.f32 %v939_v28, %v938_v17  ;;  %v1533_v21 = vld [vmem:[%s1246_s26] sm:$0xff]  ;;  %v1537_v23 = vld [vmem:[%s1246_s26 + $0x8] sm:$0xff] }
  0xec   : > { %v907_v50 = vmul.f32 1.442695, %v905_v34  ;;  %v946_v51 = vrot.slane %v945_v35, 2  ;;  %v428_v3 = vsel %vm210_vm3, %v426_v36, 0.0  ;;  %v435_v2 = vsel %vm210_vm3, %v427_v41, 0.0 }
  0xed   : > { %v909_v52 = vmul.f32 1.442695, %v906_v42  ;;  %v376_v0 = vadd.f32 %v375_v48, %v374_v27  ;;  %v387_v55 = vmul.f32 %v1390_v6, %v369_v43  ;;  %v941_v1 = vrot.slane %v940_v31, 1  ;;  %v602_v43 = vpop.permute.xlu1 %601  ;;  %v600_v48 = vpop.permute.xlu0 %599 }
  0xee   : > { %1140 = vpow2.f32 %v907_v50  ;;  %v947_v54 = vadd.f32 %v946_v51, %v945_v35  ;;  %vm451_vm1 = vcmp.ge.s32.totalorder %v1338_v40, 1  ;;  %v429_v57 = vrot.slane %v428_v3, 4 }
  0xef   : > { %v436_v47 = vrot.slane %v435_v2, 4  ;;  %1142 = vpow2.f32 %v909_v52  ;;  %v388_v59 = vmul.f32 %v1394_v11, %v376_v0  ;;  %v389_v6 = vsel %vm318_vm14, %v387_v55, 0.0  ;;  %vm1556_vm4 = vmand %vm252_vm12, %vm451_vm1 }
  0xf0   : > { %v942_v60 = vadd.f32 %v941_v1, %v940_v31  ;;  %v391_v4 = vadd.f32 %v389_v6, %v1489_v46  ;;  %v948_v7 = vrot.slane %v947_v54, 1  ;;  %v430_v8 = vadd.f32 %v429_v57, %v428_v3 }
  0xf1   : > { %v437_v44 = vadd.f32 %v436_v47, %v435_v2  ;;  %v390_v12 = vsel %vm1515_vm0, %v388_v59, 0.0  ;;  %vm450_vm2 = vcmp.ge.s32.totalorder %v1335_v39, 1  ;;  %v471_v11 = vsel %vm464_vm5, %v468_v30, %v470_v29 }
  0xf2   : > { %v968_v14 = vmul.f32 -0.005, %v942_v60  ;;  %v472_v16 = vsel %vm464_vm5, %v470_v29, %v468_v30  ;;  %v392_v17 = vadd.f32 %v390_v12, %v1496_v53  ;;  %v949_v18 = vadd.f32 %v948_v7, %v947_v54 }
  0xf3   : > { %v431_v46 = vrot.slane %v430_v8, 2  ;;  %v438_v19 = vrot.slane %v437_v44, 2  ;;  %v491_v22 = vsub.f32 %v471_v11, %v1533_v21  ;;  %v492_v27 = vsub.f32 %v472_v16, %v1537_v23 }
  0xf4   : > { %v970_v20 = vadd.f32 -4.5849676, %v968_v14  ;;  %v536_v28 = vsel %vm529_vm6, %v533_v49, %v535_v61  ;;  %v969_v34 = vmul.f32 -0.005, %v949_v18  ;;  %v537_v53 = vsel %vm529_vm6, %v535_v61, %v533_v49  ;;  %v667_v18 = vpop.permute.xlu1 %666 }
  0xf5   : > { %v432_v35 = vadd.f32 %v431_v46, %v430_v8  ;;  %v439_v29 = vadd.f32 %v438_v19, %v437_v44  ;;  %v493_v36 = vand.u32 2147483647, %v491_v22  ;;  %v494_v41 = vand.u32 2147483647, %v492_v27  ;;  %v665_v46 = vpop.permute.xlu0 %664 }
  0xf6   : > { %v972_v30 = vmul.f32 1.442695, %v970_v20  ;;  %v556_v42 = vsub.f32 %v536_v28, %v1533_v21  ;;  %v971_v31 = vadd.f32 -4.5849676, %v969_v34  ;;  %v557_v3 = vsub.f32 %v537_v53, %v1537_v23 }
  0xf7   : > { %v433_v50 = vrot.slane %v432_v35, 1  ;;  %v440_v51 = vrot.slane %v439_v29, 1  ;;  %v495_v2 = vsel %vm210_vm3, %v493_v36, 0.0  ;;  %v502_v52 = vsel %vm210_vm3, %v494_v41, 0.0 }
  0xf8   : > { %1144 = vpow2.f32 %v972_v30  ;;  %v558_v0 = vand.u32 2147483647, %v556_v42  ;;  %v1548_v55 = vpop.eup %1140  ;;  %v974_v1 = vmul.f32 1.442695, %v971_v31  ;;  %v496_v57 = vrot.slane %v495_v2, 4 }
  0xf9   : > { %v434_v56 = vadd.f32 %v433_v50, %v432_v35  ;;  %v441_v54 = vadd.f32 %v440_v51, %v439_v29  ;;  %v1550_v47 = vpop.eup %1142  ;;  %v503_v6 = vrot.slane %v502_v52, 4  ;;  %v559_v60 = vand.u32 2147483647, %v557_v3 }
  0xfa   : > { %v560_v61 = vsel %vm210_vm3, %v558_v0, 0.0  ;;  %v603_v49 = vsel %vm596_vm7, %v600_v48, %v602_v43  ;;  %1146 = vpow2.f32 %v974_v1  ;;  %v497_v44 = vadd.f32 %v496_v57, %v495_v2  ;;  %v732_v0 = vpop.permute.xlu1 %731  ;;  %v730_v1 = vpop.permute.xlu0 %729 }
  0xfb   : > { %v454_v7 = vmul.f32 %v1396_v24, %v434_v56  ;;  %v455_v8 = vmul.f32 %v1401_v45, %v441_v54  ;;  %v504_v12 = vadd.f32 %v503_v6, %v502_v52  ;;  %v561_v14 = vrot.slane %v560_v61, 4 }
  0xfc   : > { %v567_v11 = vsel %vm210_vm3, %v559_v60, 0.0  ;;  %v604_v16 = vsel %vm596_vm7, %v602_v43, %v600_v48  ;;  %v498_v22 = vrot.slane %v497_v44, 2  ;;  %v623_v53 = vsub.f32 %v603_v49, %v1533_v21 }
  0xfd   : > { %v456_v19 = vsel %vm450_vm2, %v454_v7, 0.0  ;;  %v457_v20 = vsel %vm1556_vm4, %v455_v8, 0.0  ;;  %v568_v24 = vrot.slane %v567_v11, 4  ;;  %v505_v28 = vrot.slane %v504_v12, 2 }
  0xfe   : > { %v458_v27 = vadd.f32 %v456_v19, %v391_v4  ;;  %v1572_v45 = vadd.f32 %v457_v20, %v392_v17  ;;  %v562_v34 = vadd.f32 %v561_v14, %v560_v61  ;;  %v499_v35 = vadd.f32 %v498_v22, %v497_v44 }
  0xff   : > { %v569_v29 = vadd.f32 %v568_v24, %v567_v11  ;;  %v624_v30 = vsub.f32 %v604_v16, %v1537_v23  ;;  %v506_v36 = vadd.f32 %v505_v28, %v504_v12  ;;  %v668_v42 = vsel %vm661_vm8, %v665_v46, %v667_v18 }
 0x100   : > { %v563_v41 = vrot.slane %v562_v34, 2  ;;  %v669_v43 = vsel %vm661_vm8, %v667_v18, %v665_v46  ;;  %v500_v48 = vrot.slane %v499_v35, 1  ;;  %v625_v17 = vand.u32 2147483647, %v623_v53  ;;  %v795_v53 = vpop.permute.xlu0 %794 }
 0x101   : > { %v570_v4 = vrot.slane %v569_v29, 2  ;;  %v626_v31 = vand.u32 2147483647, %v624_v30  ;;  %v507_v51 = vrot.slane %v506_v36, 1  ;;  %v688_v2 = vsub.f32 %v668_v42, %v1533_v21 }
 0x102   : > { %v1580_v50 = vpop.eup %1144  ;;  %v564_v3 = vadd.f32 %v563_v41, %v562_v34  ;;  %v689_v52 = vsub.f32 %v669_v43, %v1537_v23  ;;  %v501_v56 = vadd.f32 %v500_v48, %v499_v35  ;;  %v627_v57 = vsel %vm210_vm3, %v625_v17, 0.0 }
 0x103   : > { %v571_v54 = vadd.f32 %v570_v4, %v569_v29  ;;  %v634_v59 = vsel %vm210_vm3, %v626_v31, 0.0  ;;  %v508_v6 = vadd.f32 %v507_v51, %v506_v36  ;;  %v628_v61 = vrot.slane %v627_v57, 4  ;;  %v797_v29 = vpop.permute.xlu1 %796 }
 0x104   : > { %v565_v60 = vrot.slane %v564_v3, 1  ;;  %v635_v49 = vrot.slane %v634_v59, 4  ;;  %v1586_v7 = vpop.eup %1146  ;;  %v519_v8 = vmul.f32 %v1413_v33, %v501_v56  ;;  %v690_v12 = vand.u32 2147483647, %v688_v2 }
 0x105   : > { %v572_v44 = vrot.slane %v571_v54, 1  ;;  %v691_v14 = vand.u32 2147483647, %v689_v52  ;;  %v1590_v11 = vmul.f32 %v1417_v37, %v508_v6  ;;  %v629_v18 = vadd.f32 %v628_v61, %v627_v57  ;;  %v862_v61 = vpop.permute.xlu0 %861 }
 0x106   : > { %v566_v16 = vadd.f32 %v565_v60, %v564_v3  ;;  %v636_v46 = vadd.f32 %v635_v49, %v634_v59  ;;  %v1592_v19 = vadd.f32 %v519_v8, %v458_v27  ;;  %v692_v22 = vsel %vm210_vm3, %v690_v12, 0.0 }
 0x107   : > { %v573_v20 = vadd.f32 %v572_v44, %v571_v54  ;;  %v699_v24 = vsel %vm210_vm3, %v691_v14, 0.0  ;;  %v630_v33 = vrot.slane %v629_v18, 2  ;;  %v693_v35 = vrot.slane %v692_v22, 4  ;;  %v864_v60 = vpop.permute.xlu1 %863 }
 0x108   : > { %v1597_v28 = vmul.f32 %v1428_v63, %v566_v16  ;;  %v637_v34 = vrot.slane %v636_v46, 2  ;;  %v700_v30 = vrot.slane %v699_v24, 4  ;;  %v733_v27 = vsel %vm726_vm9, %v730_v1, %v732_v0 }
 0x109   : > { %v1600_v37 = vmul.f32 %v1431_v13, %v573_v20  ;;  %v734_v36 = vsel %vm726_vm9, %v732_v0, %v730_v1  ;;  %v631_v41 = vadd.f32 %v630_v33, %v629_v18  ;;  %v694_v43 = vadd.f32 %v693_v35, %v692_v22 }
 0x10a   : > { %v638_v42 = vadd.f32 %v637_v34, %v636_v46  ;;  %v753_v63 = vsub.f32 %v733_v27, %v1533_v21  ;;  %v701_v48 = vadd.f32 %v700_v30, %v699_v24  ;;  %v754_v4 = vsub.f32 %v734_v36, %v1537_v23 }
 0x10b   : > { %v798_v17 = vsel %vm791_vm10, %v795_v53, %v797_v29  ;;  %v799_v13 = vsel %vm791_vm10, %v797_v29, %v795_v53  ;;  %v632_v31 = vrot.slane %v631_v41, 1  ;;  %v695_v3 = vrot.slane %v694_v43, 2 }
 0x10c   : > { %v639_v51 = vrot.slane %v638_v42, 1  ;;  %v755_v2 = vand.u32 2147483647, %v753_v63  ;;  %v702_v52 = vrot.slane %v701_v48, 2  ;;  %v756_v0 = vand.u32 2147483647, %v754_v4  ;;  %v929_v63 = vpop.permute.xlu1 %928 }
 0x10d   : > { %v818_v1 = vsub.f32 %v798_v17, %v1533_v21  ;;  %v819_v56 = vsub.f32 %v799_v13, %v1537_v23  ;;  %v633_v54 = vadd.f32 %v632_v31, %v631_v41  ;;  %v696_v59 = vadd.f32 %v695_v3, %v694_v43 }
 0x10e   : > { %v640_v57 = vadd.f32 %v639_v51, %v638_v42  ;;  %v757_v6 = vsel %vm210_vm3, %v755_v2, 0.0  ;;  %v703_v49 = vadd.f32 %v702_v52, %v701_v48  ;;  %v764_v44 = vsel %vm210_vm3, %v756_v0, 0.0  ;;  %v927_v48 = vpop.permute.xlu0 %926 }
 0x10f   : > { %v758_v8 = vrot.slane %v757_v6, 4  ;;  %v820_v12 = vand.u32 2147483647, %v818_v1  ;;  %v651_v14 = vmul.f32 %v1437_v25, %v633_v54  ;;  %v697_v18 = vrot.slane %v696_v59, 1 }
 0x110   : > { %v1618_v16 = vmul.f32 %v1440_v32, %v640_v57  ;;  %v765_v46 = vrot.slane %v764_v44, 4  ;;  %v704_v20 = vrot.slane %v703_v49, 1  ;;  %v821_v24 = vand.u32 2147483647, %v819_v56 }
 0x111   : > { %v759_v22 = vadd.f32 %v758_v8, %v757_v6  ;;  %v822_v33 = vsel %vm210_vm3, %v820_v12, 0.0  ;;  %v1623_v34 = vsel %vm318_vm14, %v651_v14, 0.0  ;;  %v698_v35 = vadd.f32 %v697_v18, %v696_v59 }
 0x112   : > { %v766_v29 = vadd.f32 %v765_v46, %v764_v44  ;;  %v823_v53 = vrot.slane %v822_v33, 4  ;;  %v705_v30 = vadd.f32 %v704_v20, %v703_v49  ;;  %v829_v25 = vsel %vm210_vm3, %v821_v24, 0.0 }
 0x113   : > { %v760_v27 = vrot.slane %v759_v22, 2  ;;  %v865_v32 = vsel %vm858_vm11, %v862_v61, %v864_v60  ;;  %v1629_v36 = vmul.f32 %v1448_v9, %v698_v35  ;;  %v830_v43 = vrot.slane %v829_v25, 4 }
 0x114   : > { %v767_v41 = vrot.slane %v766_v29, 2  ;;  %v824_v42 = vadd.f32 %v823_v53, %v822_v33  ;;  %v1632_v4 = vmul.f32 %v1451_v15, %v705_v30  ;;  %v866_v13 = vsel %vm858_vm11, %v864_v60, %v862_v61 }
 0x115   : > { %v761_v17 = vadd.f32 %v760_v27, %v759_v22  ;;  %v885_v31 = vsub.f32 %v865_v32, %v1533_v21  ;;  %v831_v2 = vadd.f32 %v830_v43, %v829_v25  ;;  %v886_v9 = vsub.f32 %v866_v13, %v1537_v23 }
 0x116   : > { %v768_v51 = vadd.f32 %v767_v41, %v766_v29  ;;  %v825_v3 = vrot.slane %v824_v42, 2  ;;  %v930_v1 = vsel %vm923_vm13, %v927_v48, %v929_v63  ;;  %v931_v15 = vsel %vm923_vm13, %v929_v63, %v927_v48 }
 0x117   : > { %v762_v52 = vrot.slane %v761_v17, 1  ;;  %v887_v0 = vand.u32 2147483647, %v885_v31  ;;  %v832_v57 = vrot.slane %v831_v2, 2  ;;  %v888_v59 = vand.u32 2147483647, %v886_v9 }
 0x118   : > { %v769_v56 = vrot.slane %v768_v51, 1  ;;  %v826_v54 = vadd.f32 %v825_v3, %v824_v42  ;;  %v950_v61 = vsub.f32 %v930_v1, %v1533_v21  ;;  %v951_v49 = vsub.f32 %v931_v15, %v1537_v23 }
 0x119   : > { %v763_v6 = vadd.f32 %v762_v52, %v761_v17  ;;  %v889_v60 = vsel %vm210_vm3, %v887_v0, 0.0  ;;  %v833_v12 = vadd.f32 %v832_v57, %v831_v2  ;;  %v896_v5 = vsel %vm210_vm3, %v888_v59, 0.0 }
 0x11a   : > { %v770_v8 = vadd.f32 %v769_v56, %v768_v51  ;;  %v827_v44 = vrot.slane %v826_v54, 1  ;;  %v890_v14 = vrot.slane %v889_v60, 4  ;;  %v952_v46 = vand.u32 2147483647, %v950_v61 }
 0x11b   : > { %v781_v18 = vmul.f32 %v1469_v62, %v763_v6  ;;  %v953_v20 = vand.u32 2147483647, %v951_v49  ;;  %v834_v33 = vrot.slane %v833_v12, 1  ;;  %v897_v29 = vrot.slane %v896_v5, 4 }
 0x11c   : > { %v782_v22 = vmul.f32 %v1475_v10, %v770_v8  ;;  %v828_v24 = vadd.f32 %v827_v44, %v826_v54  ;;  %v891_v35 = vadd.f32 %v890_v14, %v889_v60  ;;  %v954_v21 = vsel %vm210_vm3, %v952_v46, 0.0 }
 0x11d   : > { %v961_v23 = vsel %vm210_vm3, %v953_v20, 0.0  ;;  %vm518_vm5 = vcmp.lt.s32.totalorder %v1325_v26, 224  ;;  %v835_v53 = vadd.f32 %v834_v33, %v833_v12  ;;  %v955_v27 = vrot.slane %v954_v21, 4 }
 0x11e   : > { %v892_v30 = vrot.slane %v891_v35, 2  ;;  %v962_v62 = vrot.slane %v961_v23, 4  ;;  %vm1655_vm6 = vmand %vm518_vm5, %vm319_vm15  ;;  %v898_v25 = vadd.f32 %v897_v29, %v896_v5  ;;  %v522_v32 = vsel %vm518_vm5, %v1590_v11, 0.0 }
 0x11f   : > { %vm582_vm3 = vcmp.lt.s32.totalorder %v1335_v39, 14  ;;  %vm583_vm7 = vcmp.lt.s32.totalorder %v1338_v40, 14  ;;  %v956_v42 = vadd.f32 %v955_v27, %v954_v21  ;;  %v524_v63 = vadd.f32 %v522_v32, %v1572_v45  ;;  %vm1669_vm8 = vmand %vm518_vm5, %vm451_vm1 }
 0x120   : > { %v893_v41 = vadd.f32 %v892_v30, %v891_v35  ;;  %v963_v43 = vadd.f32 %v962_v62, %v961_v23  ;;  %v899_v17 = vrot.slane %v898_v25, 2  ;;  %v588_v11 = vsel %vm582_vm3, %v1597_v28, 0.0  ;;  %vm1687_vm9 = vmand %vm252_vm12, %vm583_vm7 }
 0x121   : > { %v589_v13 = vsel %vm583_vm7, %v1600_v37, 0.0  ;;  %v654_v45 = vsel %vm1655_vm6, %v1618_v16, 0.0  ;;  %v957_v51 = vrot.slane %v956_v42, 2  ;;  %v590_v2 = vadd.f32 %v588_v11, %v1592_v19  ;;  %vm1709_vm13 = vmand %vm518_vm5, %vm583_vm7 }
 0x122   : > { %v894_v31 = vrot.slane %v893_v41, 1  ;;  %v964_v3 = vrot.slane %v963_v43, 2  ;;  %v900_v28 = vadd.f32 %v899_v17, %v898_v25  ;;  %v591_v52 = vadd.f32 %v589_v13, %v524_v63 }
 0x123   : > { %v718_v37 = vsel %vm450_vm2, %v1629_v36, 0.0  ;;  %v719_v16 = vsel %vm1669_vm8, %v1632_v4, 0.0  ;;  %v958_v19 = vadd.f32 %v957_v51, %v956_v42  ;;  %v655_v15 = vadd.f32 %v1623_v34, %v590_v2 }
 0x124   : > { %v895_v0 = vadd.f32 %v894_v31, %v893_v41  ;;  %v965_v1 = vadd.f32 %v964_v3, %v963_v43  ;;  %v901_v56 = vrot.slane %v900_v28, 1  ;;  %v656_v54 = vadd.f32 %v654_v45, %v591_v52 }
 0x125   : > { %v783_v57 = vsel %vm582_vm3, %v781_v18, 0.0  ;;  %v784_v59 = vsel %vm1687_vm9, %v782_v22, 0.0  ;;  %v959_v6 = vrot.slane %v958_v19, 1  ;;  %v720_v36 = vadd.f32 %v718_v37, %v655_v15 }
 0x126   : > { %v966_v60 = vrot.slane %v965_v1, 1  ;;  %vm844_vm10 = vcmp.ge.s32.totalorder %v1335_v39, 2  ;;  %v902_v61 = vadd.f32 %v901_v56, %v900_v28  ;;  %v721_v4 = vadd.f32 %v719_v16, %v656_v54 }
 0x127   : > { %vm845_vm11 = vcmp.ge.s32.totalorder %v1338_v40, 2  ;;  %v848_v49 = vmul.f32 %v1494_v38, %v828_v24  ;;  %v785_v8 = vadd.f32 %v783_v57, %v720_v36  ;;  %v849_v44 = vmul.f32 %v1499_v58, %v835_v53 }
 0x128   : > { %vm847_vm14 = vmand %vm252_vm12, %vm845_vm11  ;;  %v913_v12 = vmul.f32 %v1548_v55, %v895_v0  ;;  %v960_v14 = vadd.f32 %v959_v6, %v958_v19  ;;  %v786_v38 = vadd.f32 %v784_v59, %v721_v4  ;;  %v914_v5 = vmul.f32 %v1550_v47, %v902_v61 }
 0x129   : > { %v850_v18 = vsel %vm844_vm10, %v848_v49, 0.0  ;;  %v967_v46 = vadd.f32 %v966_v60, %v965_v1  ;;  %v851_v20 = vsel %vm847_vm14, %v849_v44, 0.0  ;;  %vm977_vm12 = vmand %vm518_vm5, %vm845_vm11  ;;  %vm984_vm15 = vcmask 1040384  }
 0x12a   : > { %v852_v22 = vadd.f32 %v850_v18, %v785_v8  ;;  %v915_v24 = vsel %vm582_vm3, %v913_v12, 0.0  ;;  %v978_v58 = vmul.f32 %v1580_v50, %v960_v14  ;;  %v853_v55 = vadd.f32 %v851_v20, %v786_v38 }
 0x12b   : > { %v916_v33 = vsel %vm1709_vm13, %v914_v5, 0.0  ;;  %v979_v35 = vmul.f32 %v1586_v7, %v967_v46 }
 0x12c   : > { %v917_v47 = vadd.f32 %v915_v24, %v852_v22  ;;  %v980_v29 = vsel %vm844_vm10, %v978_v58, 0.0  ;;  %v918_v21 = vadd.f32 %v916_v33, %v853_v55 }
 0x12d   : > { %v981_v23 = vsel %vm977_vm12, %v979_v35, 0.0 }
 0x12e   : > { %v982_v40 = vadd.f32 %v980_v29, %v917_v47  ;;  %v983_v53 = vadd.f32 %v981_v23, %v918_v21 }
 0x130   : > { %v985_v26 = vsel %vm984_vm15, %v982_v40, 0.0  ;;  %v986_v30 = vsel %vm984_vm15, %v983_v53, 0.0 }
 0x131   : > { %v987_v27 = vadd.f32 %v986_v30, %v985_v26 }
 0x133   : > { %988 = vadd.xlane.f32.xlu0 %v987_v27 }
 0x1c0   : > { %v989_v50 = vpop.xlane.xlu0 %988 }
 0x1c1   : > { %v990_v62 = vrot.slane %v989_v50, 4 }
 0x1c3   : > { %v991_v10 = vadd.f32 %v990_v62, %v989_v50 }
 0x1c5   : > { %v992_v25 = vrot.slane %v991_v10, 2 }
 0x1c7   : > { %v993_v32 = vadd.f32 %v992_v25, %v991_v10 }
 0x1c9   : > { %v994_v7 = vrot.slane %v993_v32, 1 }
 0x1cb   : > { %v995_v41 = vadd.f32 %v994_v7, %v993_v32 }
 0x1cd   : > { %1078 = vpush %v995_v41 }
 0x1fe   : > { %s1079_s6 = spop %1078 }
 0x1ff   : > { %v997_v39 = vstv %s1079_s6 }
 0x200   : > { %998 = vst [vmem:[%s161_s5] sm:$0xff] %v997_v39 }
 0x201 PF: > { %s12_s9 = sadd.s32 1, %s1156_s9  }
 0x202   : > { %p9_p4 = scmp.ge.s32.totalorder %s12_s9, 4  }
 0x204   :  { %11 = sbr.rel (!%p9_p4) target bundleno = 1 (0x1), region = 61 }

</bundles_post_ra>
